<compile_context>
chip_gen: v7x
topology: tpu7x:2x2x1
jax: 0.10.0
libtpu: 0.0.40
codegen_flags: <defaults>
</compile_context>

<pallas_src>
import functools

import jax
import jax.numpy as jnp
from jax.experimental import pallas as pl
from jax.experimental.pallas import tpu as pltpu


def _cropcon_kernel(feats_ref, featsT_ref, lab_row_ref, lab_col_ref, colmask_ref,
                    protosT_ref, invfreq_ref, loss_ref,
                    exp_acc, match_acc, *, ignore_index):
    i = pl.program_id(0)   # row tile of the similarity matrix
    j = pl.program_id(1)   # column tile (reduction axis)

    @pl.when(j == 0)
    def _():
        exp_acc[...] = jnp.zeros_like(exp_acc)
        match_acc[...] = jnp.zeros_like(match_acc)

    f_row = feats_ref[...]          # (TR, D) bf16, pre-scaled by 1/tau
    f_colT = featsT_ref[...]        # (D, TC) bf16
    lab_r = lab_row_ref[...]        # (TR, 1) int32
    lab_c = lab_col_ref[...]        # (1, TC) int32
    col_ok = colmask_ref[...]       # (1, TC) f32: 1.0 valid col, 0.0 invalid/pad

    TR = f_row.shape[0]
    TC = f_colT.shape[1]

    # sim already includes the 1/tau scale (folded into f_row in the wrapper)
    sim = jnp.dot(f_row, f_colT, preferred_element_type=jnp.float32)   # (TR, TC)
    e = jnp.exp(sim) * col_ok                                          # mask invalid cols
    match = lab_r == lab_c                                             # (TR, TC) bool

    # Only tiles crossed by the global diagonal need the self-similarity mask.
    diag_tile = jnp.logical_and(i * TR < (j + 1) * TC, j * TC < (i + 1) * TR)

    @pl.when(diag_tile)
    def _():
        row_g = i * TR + jax.lax.broadcasted_iota(jnp.int32, (TR, TC), 0)
        col_g = j * TC + jax.lax.broadcasted_iota(jnp.int32, (TR, TC), 1)
        e_d = jnp.where(row_g == col_g, 0.0, e)
        exp_acc[...] = exp_acc[...] + jnp.sum(e_d, axis=-1, keepdims=True)
        match_acc[...] = match_acc[...] + jnp.sum(jnp.where(match, e_d, 0.0),
                                                  axis=-1, keepdims=True)

    @pl.when(jnp.logical_not(diag_tile))
    def _():
        exp_acc[...] = exp_acc[...] + jnp.sum(e, axis=-1, keepdims=True)
        match_acc[...] = match_acc[...] + jnp.sum(jnp.where(match, e, 0.0),
                                                  axis=-1, keepdims=True)

    @pl.when(j == pl.num_programs(1) - 1)
    def _():
        protoT = protosT_ref[...]           # (D, C) bf16
        inv_freq = invfreq_ref[...]         # (1, C) f32, = 1/cls_freq
        C = protoT.shape[1]

        psim = jnp.dot(f_row, protoT, preferred_element_type=jnp.float32)  # (TR, C)
        pe = jnp.exp(psim)

        col_c = jax.lax.broadcasted_iota(jnp.int32, (TR, C), 1)
        onehot_tgt = col_c == lab_r                      # (TR, C)
        row_valid = lab_r != ignore_index                # (TR, 1)

        numer_proto = jnp.sum(jnp.where(onehot_tgt, pe, 0.0), axis=-1, keepdims=True)
        denom_proto = jnp.sum(pe * inv_freq, axis=-1, keepdims=True)
        # 1/cls_freq[label_i] (0.0 on invalid rows -> multiply, never divide)
        inv_freq_row = jnp.sum(jnp.where(onehot_tgt, inv_freq, 0.0),
                               axis=-1, keepdims=True)

        numer = match_acc[...] + numer_proto
        denom = exp_acc[...] * inv_freq_row + denom_proto
        loss = -jnp.log(numer / (denom + 1e-12))
        loss_ref[...] = jnp.where(row_valid, loss, 0.0)


def _round_up(x, m):
    return (x + m - 1) // m * m


def _largest_divisor(n, cap, step=8):
    """Largest multiple of `step` that divides n and is <= cap."""
    best = step
    d = step
    lim = min(cap, n)
    while d <= lim:
        if n % d == 0:
            best = d
        d += step
    return best


def _vmem_limit_bytes():
    cap = 64 * 1024 * 1024            # conservative fallback (v7x physical)
    try:
        cap = int(pltpu.get_tpu_info().vmem_capacity_bytes)
    except Exception:
        pass
    # leave headroom under the physical capacity (v5e/v6e 128 MiB, v7x 64 MiB)
    return min(cap * 3 // 4, 100 * 1024 * 1024)


def _select_tiles(B, D, C, tc_max, tr_max, vmem_limit):
    LANE = 128
    tc = min(_round_up(tc_max, LANE), _round_up(max(B, 1), LANE))
    while True:
        b_pad = _round_up(max(B, 1), tc)
        tr_cap = tr_max
        if b_pad >= 256:
            # guarantee >=2 row tiles so the "parallel" axis shards on v7x megacore
            tr_cap = min(tr_cap, b_pad // 2)
        tr = _largest_divisor(b_pad, max(tr_cap, 8))
        est = (2 * 2 * 2 * (tr * D + D * tc)     # double-buffered bf16 input blocks
               + 8 * tr * tc * 4                 # f32 (TR,TC) temporaries
               + 2 * 2 * D * C                   # protos^T block
               + 64 * (tr + tc + C))             # labels/masks/acc/output (small)
        if est <= vmem_limit // 2 or tc <= LANE:
            return tr, tc, b_pad
        tc = max(LANE, tc // 2)


def cropcon_loss(protos, proj2, target2, proj3=None, target3=None,
                 *, tau=0.1, ignore_index=-1, tc_max=1024, tr_max=512):
    """CropConLoss.forward with bcl_config='original'."""
    if proj3 is not None:
        feats = jnp.concatenate([proj2, proj3], axis=0)
        labels = jnp.concatenate([target2, target3], axis=0)
    else:
        feats = proj2
        labels = target2
    labels = labels.astype(jnp.int32)

    # L2 normalisation (tiny B x D / C x D passes, kept in plain JAX, f32)
    feats = feats.astype(jnp.float32)
    feats = feats / jnp.maximum(jnp.linalg.norm(feats, axis=-1, keepdims=True), 1e-12)
    protos_n = protos.astype(jnp.float32)
    protos_n = protos_n / jnp.maximum(
        jnp.linalg.norm(protos_n, axis=-1, keepdims=True), 1e-12)

    B, D = feats.shape
    C = protos_n.shape[0]

    valid = labels != ignore_index
    count = jnp.sum(valid.astype(jnp.float32))

    # cls_freq = bincount(cat([valid labels, arange(C)])) + 1e-6
    onehot = jax.nn.one_hot(jnp.clip(labels, 0, C - 1), C, dtype=jnp.float32)
    onehot = onehot * valid[:, None].astype(jnp.float32)
    cls_freq = onehot.sum(axis=0) + 1.0 + 1e-6           # (C,)
    inv_cls_freq = (1.0 / cls_freq).reshape(1, C)        # precomputed reciprocal

    # tiles: TC lane-dense, TR large (capped for v7x megacore + VMEM budget)
    vmem_limit = _vmem_limit_bytes()
    TR, TC, B_pad = _select_tiles(B, D, C, tc_max, tr_max, vmem_limit)

    pad = B_pad - B
    if pad:
        feats_p = jnp.pad(feats, ((0, pad), (0, 0)))
        labels_p = jnp.pad(labels, (0, pad), constant_values=ignore_index)
    else:
        feats_p, labels_p = feats, labels

    # bf16 MXU operands; 1/tau folded into the row operand only
    feats_row = (feats_p * (1.0 / float(tau))).astype(jnp.bfloat16)   # (B_pad, D)
    feats_t = feats_p.T.astype(jnp.bfloat16)                          # (D, B_pad)
    protos_t = protos_n.T.astype(jnp.bfloat16)                        # (D, C)

    lab_row = labels_p.reshape(B_pad, 1)
    lab_col = labels_p.reshape(1, B_pad)
    colmask = (labels_p != ignore_index).astype(jnp.float32).reshape(1, B_pad)

    nR = B_pad // TR
    nC = B_pad // TC
    kernel = functools.partial(_cropcon_kernel, ignore_index=int(ignore_index))

    per_row_loss = pl.pallas_call(
        kernel,
        out_shape=jax.ShapeDtypeStruct((B_pad, 1), jnp.float32),
        grid_spec=pltpu.PrefetchScalarGridSpec(
            num_scalar_prefetch=0,
            grid=(nR, nC),
            in_specs=[
                pl.BlockSpec((TR, D), lambda i, j: (i, 0)),   # feats rows (bf16, /tau)
                pl.BlockSpec((D, TC), lambda i, j: (0, j)),   # feats^T cols (bf16)
                pl.BlockSpec((TR, 1), lambda i, j: (i, 0)),   # labels (rows)
                pl.BlockSpec((1, TC), lambda i, j: (0, j)),   # labels (cols)
                pl.BlockSpec((1, TC), lambda i, j: (0, j)),   # column validity mask
                pl.BlockSpec((D, C), lambda i, j: (0, 0)),    # protos^T (bf16)
                pl.BlockSpec((1, C), lambda i, j: (0, 0)),    # 1/cls_freq
            ],
            out_specs=pl.BlockSpec((TR, 1), lambda i, j: (i, 0)),
            scratch_shapes=[pltpu.VMEM((TR, 1), jnp.float32),
                            pltpu.VMEM((TR, 1), jnp.float32)],
        ),
        compiler_params=pltpu.CompilerParams(
            dimension_semantics=("parallel", "arbitrary"),
            vmem_limit_bytes=int(vmem_limit)),
    )(feats_row, feats_t, lab_row, lab_col, colmask, protos_t, inv_cls_freq)

    # padded/invalid rows contribute exactly 0 -> mean over valid rows
    loss_ce = jnp.sum(per_row_loss) / jnp.maximum(count, 1.0)

    # prototype regularisers (C x D, tiny — plain JAX, f32)
    var = jnp.var(protos_n, axis=0, ddof=1)
    prot_var_reg = jnp.mean(jax.nn.relu(1.0 - jnp.sqrt(var + 1e-12)))
    cov = jnp.matmul(protos_n.T, protos_n,
                     precision=jax.lax.Precision.HIGHEST) / (C - 1)
    cov2 = jnp.square(cov)
    prot_cov_reg = (jnp.sum(cov2) - jnp.sum(jnp.diag(cov2))) / D

    total = loss_ce + prot_var_reg + 0.1 * prot_cov_reg
    # reference returns exactly 0.0 when no valid pixels remain
    return jnp.where(count > 0, total, 0.0)


def _reference_cropcon(protos, proj2, target2, proj3, target3, tau, ignore_index):
    """Pure-JAX (eager) transcription of the PyTorch forward_original."""
    hp = jax.lax.Precision.HIGHEST
    feats = jnp.concatenate([proj2, proj3], axis=0)
    labels = jnp.concatenate([target2, target3], axis=0).astype(jnp.int32)
    feats = feats / jnp.maximum(jnp.linalg.norm(feats, axis=-1, keepdims=True), 1e-12)
    protos = protos / jnp.maximum(jnp.linalg.norm(protos, axis=-1, keepdims=True), 1e-12)
    valid = labels != ignore_index
    feats = feats[valid]
    labels = labels[valid]
    M, D = feats.shape
    C = protos.shape[0]
    sim = jnp.matmul(feats, feats.T, precision=hp) / tau
    psim = jnp.matmul(feats, protos.T, precision=hp) / tau
    eye = jnp.eye(M, dtype=bool)
    sim = jnp.where(eye, -jnp.inf, sim)
    match = labels[:, None] == labels[None, :]
    numer_region = jnp.exp(sim) * match
    numer_proto = jnp.take_along_axis(jnp.exp(psim), labels[:, None], axis=1)[:, 0]
    numer = numer_region.sum(1) + numer_proto
    labels_all = jnp.concatenate([labels, jnp.arange(C, dtype=jnp.int32)])
    cls_freq = jnp.bincount(labels_all, length=C).astype(jnp.float32) + 1e-6
    feat_w = cls_freq[labels]
    weight_matrix = jnp.where(eye, 1e6, feat_w[:, None])
    denom_region = jnp.exp(sim) / weight_matrix
    denom_proto = jnp.exp(psim) / cls_freq[None, :]
    denom = denom_region.sum(1) + denom_proto.sum(1)
    loss = -jnp.log(numer / (denom + 1e-12))
    var = jnp.var(protos, axis=0, ddof=1)
    prot_var_reg = jnp.mean(jax.nn.relu(1.0 - jnp.sqrt(var + 1e-12)))
    cov = jnp.matmul(protos.T, protos, precision=hp) / (C - 1)
    cov2 = jnp.square(cov)
    prot_cov_reg = (jnp.sum(cov2) - jnp.sum(jnp.diag(cov2))) / D
    return loss.mean() + prot_var_reg + 0.1 * prot_cov_reg


if __name__ == "__main__":
    key = jax.random.PRNGKey(0)
    C, D = 4, 32            # num prototype classes, feature dim
    M2 = M3 = 96            # sampled pixel features from two crops
    tau = 0.1
    ignore_index = -1

    k1, k2, k3, k4, k5 = jax.random.split(key, 5)
    protos = jax.random.normal(k1, (C, D), dtype=jnp.float32)
    proj2 = jax.random.normal(k2, (M2, D), dtype=jnp.float32)
    proj3 = jax.random.normal(k3, (M3, D), dtype=jnp.float32)
    target2 = jax.random.randint(k4, (M2,), 0, C).astype(jnp.int32)
    target3 = jax.random.randint(k5, (M3,), 0, C).astype(jnp.int32)
    # sprinkle in some ignored entries
    target2 = target2.at[:5].set(ignore_index)
    target3 = target3.at[:3].set(ignore_index)

    loss = cropcon_loss(protos, proj2, target2, proj3, target3,
                        tau=tau, ignore_index=ignore_index)
    jax.block_until_ready(loss)

    ref = _reference_cropcon(protos, proj2, target2, proj3, target3,
                             tau, ignore_index)
    # slightly looser tolerance than v1: kernel matmul operands are bf16
    assert jnp.allclose(loss, ref, atol=2e-2, rtol=2e-2), (loss, ref)

    print("KERNEL_OK")
</pallas_src>

<mosaic_0001>
module attributes {stable_mosaic.version = 11 : i64} {
  func.func @_cropcon_kernel(%arg0: i32, %arg1: i32, %arg2: memref<128x32xbf16, #tpu.memory_space<vmem>>, %arg3: memref<32x256xbf16, #tpu.memory_space<vmem>>, %arg4: memref<128x1xi32, #tpu.memory_space<vmem>>, %arg5: memref<1x256xi32, #tpu.memory_space<vmem>>, %arg6: memref<1x256xf32, #tpu.memory_space<vmem>>, %arg7: memref<32x4xbf16, #tpu.memory_space<vmem>>, %arg8: memref<1x4xf32, #tpu.memory_space<vmem>>, %arg9: memref<128x1xf32, #tpu.memory_space<vmem>>, %arg10: memref<128x1xf32, #tpu.memory_space<vmem>>, %arg11: memref<128x1xf32, #tpu.memory_space<vmem>>) attributes {dimension_semantics = [#tpu.dimension_semantics<parallel>, #tpu.dimension_semantics<arbitrary>], iteration_bounds = array<i64: 2, 1>, scalar_prefetch = 0 : i64, scratch_operands = 2 : i64, tpu.core_type = #tpu.core_type<tc>, window_params = [{transform_indices = @transform_0, window_bounds = array<i64: 128, 32>}, {transform_indices = @transform_1, window_bounds = array<i64: 32, 256>}, {transform_indices = @transform_2, window_bounds = array<i64: 128, 1>}, {transform_indices = @transform_3, window_bounds = array<i64: 1, 256>}, {transform_indices = @transform_4, window_bounds = array<i64: 1, 256>}, {pipeline_mode = #tpu.pipeline_mode<synchronous>, transform_indices = @transform_5, window_bounds = array<i64: 32, 4>}, {pipeline_mode = #tpu.pipeline_mode<synchronous>, transform_indices = @transform_6, window_bounds = array<i64: 1, 4>}, {transform_indices = @transform_7, window_bounds = array<i64: 128, 1>}]} {
    %c0_i32 = arith.constant 0 : i32
    %0 = arith.cmpi eq, %arg1, %c0_i32 : i32
    %1 = arith.extui %0 : i1 to i32
    %c0_i32_0 = arith.constant 0 : i32
    %2 = arith.cmpi ne, %1, %c0_i32_0 : i32
    scf.if %2 {
      %cst_17 = arith.constant 0.000000e+00 : f32
      %32 = vector.broadcast %cst_17 : f32 to vector<128x1xf32>
      %c0_18 = arith.constant 0 : index
      %c0_19 = arith.constant 0 : index
      %33 = vector.load %arg10[%c0_18, %c0_19] : memref<128x1xf32, #tpu.memory_space<vmem>>, vector<128x1xf32>
      tpu.vector_store %arg10[%c0_18, %c0_19], %32 {strides = array<i32>} : memref<128x1xf32, #tpu.memory_space<vmem>>, vector<128x1xf32>,
      %cst_20 = arith.constant 0.000000e+00 : f32
      %34 = vector.broadcast %cst_20 : f32 to vector<128x1xf32>
      %c0_21 = arith.constant 0 : index
      %c0_22 = arith.constant 0 : index
      %35 = vector.load %arg11[%c0_21, %c0_22] : memref<128x1xf32, #tpu.memory_space<vmem>>, vector<128x1xf32>
      tpu.vector_store %arg11[%c0_21, %c0_22], %34 {strides = array<i32>} : memref<128x1xf32, #tpu.memory_space<vmem>>, vector<128x1xf32>,
    } else {
    }
    %c0 = arith.constant 0 : index
    %c0_1 = arith.constant 0 : index
    %3 = vector.load %arg2[%c0, %c0_1] : memref<128x32xbf16, #tpu.memory_space<vmem>>, vector<128x32xbf16>
    %c0_2 = arith.constant 0 : index
    %c0_3 = arith.constant 0 : index
    %4 = vector.load %arg3[%c0_2, %c0_3] : memref<32x256xbf16, #tpu.memory_space<vmem>>, vector<32x256xbf16>
    %c0_4 = arith.constant 0 : index
    %c0_5 = arith.constant 0 : index
    %5 = vector.load %arg4[%c0_4, %c0_5] : memref<128x1xi32, #tpu.memory_space<vmem>>, vector<128x1xi32>
    %c0_6 = arith.constant 0 : index
    %c0_7 = arith.constant 0 : index
    %6 = vector.load %arg5[%c0_6, %c0_7] : memref<1x256xi32, #tpu.memory_space<vmem>>, vector<1x256xi32>
    %c0_8 = arith.constant 0 : index
    %c0_9 = arith.constant 0 : index
    %7 = vector.load %arg6[%c0_8, %c0_9] : memref<1x256xf32, #tpu.memory_space<vmem>>, vector<1x256xf32>
    %cst = arith.constant dense<0.000000e+00> : vector<128x256xf32>
    %8 = tpu.matmul %3, %4, %cst {dimension_numbers = #tpu.dot_dimension_numbers<[1], [0], [0], [1], [0, 0, 1, 1], [], []>} : vector<128x32xbf16>, vector<32x256xbf16>, vector<128x256xf32> -> vector<128x256xf32>
    %9 = math.exp %8 : vector<128x256xf32>
    %10 = vector.broadcast %7 : vector<1x256xf32> to vector<128x256xf32>
    %11 = arith.mulf %9, %10 : vector<128x256xf32>
    %12 = vector.broadcast %5 : vector<128x1xi32> to vector<128x256xi32>
    %13 = vector.broadcast %6 : vector<1x256xi32> to vector<128x256xi32>
    %14 = arith.cmpi eq, %12, %13 : vector<128x256xi32>
    %c128_i32 = arith.constant 128 : i32
    %15 = arith.muli %arg0, %c128_i32 : i32
    %c1_i32 = arith.constant 1 : i32
    %16 = arith.addi %arg1, %c1_i32 : i32
    %c256_i32 = arith.constant 256 : i32
    %17 = arith.muli %16, %c256_i32 : i32
    %18 = arith.cmpi slt, %15, %17 : i32
    %c256_i32_10 = arith.constant 256 : i32
    %19 = arith.muli %arg1, %c256_i32_10 : i32
    %c1_i32_11 = arith.constant 1 : i32
    %20 = arith.addi %arg0, %c1_i32_11 : i32
    %c128_i32_12 = arith.constant 128 : i32
    %21 = arith.muli %20, %c128_i32_12 : i32
    %22 = arith.cmpi slt, %19, %21 : i32
    %23 = arith.andi %18, %22 : i1
    %24 = arith.extui %23 : i1 to i32
    %c0_i32_13 = arith.constant 0 : i32
    %25 = arith.cmpi ne, %24, %c0_i32_13 : i32
    scf.if %25 {
      %c128_i32_17 = arith.constant 128 : i32
      %32 = arith.muli %arg0, %c128_i32_17 : i32
      %33 = tpu.iota {dimensions = array<i32: 0>} : vector<128x256xi32>
      %34 = vector.broadcast %32 : i32 to vector<128x256xi32>
      %35 = arith.addi %34, %33 : vector<128x256xi32>
      %c256_i32_18 = arith.constant 256 : i32
      %36 = arith.muli %arg1, %c256_i32_18 : i32
      %37 = tpu.iota {dimensions = array<i32: 1>} : vector<128x256xi32>
      %38 = vector.broadcast %36 : i32 to vector<128x256xi32>
      %39 = arith.addi %38, %37 : vector<128x256xi32>
      %40 = arith.cmpi eq, %35, %39 : vector<128x256xi32>
      %cst_19 = arith.constant 0.000000e+00 : f32
      %41 = vector.broadcast %cst_19 : f32 to vector<128x256xf32>
      %42 = arith.select %40, %41, %11 : vector<128x256xi1>, vector<128x256xf32>
      %c0_20 = arith.constant 0 : index
      %c0_21 = arith.constant 0 : index
      %43 = vector.load %arg10[%c0_20, %c0_21] : memref<128x1xf32, #tpu.memory_space<vmem>>, vector<128x1xf32>
      %cst_22 = arith.constant dense<0.000000e+00> : vector<128xf32>
      %44 = vector.multi_reduction <add>, %42, %cst_22 [1] : vector<128x256xf32> to vector<128xf32>
      %45 = vector.shape_cast %44 : vector<128xf32> to vector<128x1xf32>
      %46 = arith.addf %43, %45 : vector<128x1xf32>
      %c0_23 = arith.constant 0 : index
      %c0_24 = arith.constant 0 : index
      %47 = vector.load %arg10[%c0_23, %c0_24] : memref<128x1xf32, #tpu.memory_space<vmem>>, vector<128x1xf32>
      tpu.vector_store %arg10[%c0_23, %c0_24], %46 {strides = array<i32>} : memref<128x1xf32, #tpu.memory_space<vmem>>, vector<128x1xf32>,
      %c0_25 = arith.constant 0 : index
      %c0_26 = arith.constant 0 : index
      %48 = vector.load %arg11[%c0_25, %c0_26] : memref<128x1xf32, #tpu.memory_space<vmem>>, vector<128x1xf32>
      %cst_27 = arith.constant 0.000000e+00 : f32
      %49 = vector.broadcast %cst_27 : f32 to vector<128x256xf32>
      %50 = arith.select %14, %42, %49 : vector<128x256xi1>, vector<128x256xf32>
      %cst_28 = arith.constant dense<0.000000e+00> : vector<128xf32>
      %51 = vector.multi_reduction <add>, %50, %cst_28 [1] : vector<128x256xf32> to vector<128xf32>
      %52 = vector.shape_cast %51 : vector<128xf32> to vector<128x1xf32>
      %53 = arith.addf %48, %52 : vector<128x1xf32>
      %c0_29 = arith.constant 0 : index
      %c0_30 = arith.constant 0 : index
      %54 = vector.load %arg11[%c0_29, %c0_30] : memref<128x1xf32, #tpu.memory_space<vmem>>, vector<128x1xf32>
      tpu.vector_store %arg11[%c0_29, %c0_30], %53 {strides = array<i32>} : memref<128x1xf32, #tpu.memory_space<vmem>>, vector<128x1xf32>,
    } else {
    }
    %true = arith.constant true
    %26 = arith.xori %23, %true : i1
    %27 = arith.extui %26 : i1 to i32
    %c0_i32_14 = arith.constant 0 : i32
    %28 = arith.cmpi ne, %27, %c0_i32_14 : i32
    scf.if %28 {
      %c0_17 = arith.constant 0 : index
      %c0_18 = arith.constant 0 : index
      %32 = vector.load %arg10[%c0_17, %c0_18] : memref<128x1xf32, #tpu.memory_space<vmem>>, vector<128x1xf32>
      %cst_19 = arith.constant dense<0.000000e+00> : vector<128xf32>
      %33 = vector.multi_reduction <add>, %11, %cst_19 [1] : vector<128x256xf32> to vector<128xf32>
      %34 = vector.shape_cast %33 : vector<128xf32> to vector<128x1xf32>
      %35 = arith.addf %32, %34 : vector<128x1xf32>
      %c0_20 = arith.constant 0 : index
      %c0_21 = arith.constant 0 : index
      %36 = vector.load %arg10[%c0_20, %c0_21] : memref<128x1xf32, #tpu.memory_space<vmem>>, vector<128x1xf32>
      tpu.vector_store %arg10[%c0_20, %c0_21], %35 {strides = array<i32>} : memref<128x1xf32, #tpu.memory_space<vmem>>, vector<128x1xf32>,
      %c0_22 = arith.constant 0 : index
      %c0_23 = arith.constant 0 : index
      %37 = vector.load %arg11[%c0_22, %c0_23] : memref<128x1xf32, #tpu.memory_space<vmem>>, vector<128x1xf32>
      %cst_24 = arith.constant 0.000000e+00 : f32
      %38 = vector.broadcast %cst_24 : f32 to vector<128x256xf32>
      %39 = arith.select %14, %11, %38 : vector<128x256xi1>, vector<128x256xf32>
      %cst_25 = arith.constant dense<0.000000e+00> : vector<128xf32>
      %40 = vector.multi_reduction <add>, %39, %cst_25 [1] : vector<128x256xf32> to vector<128xf32>
      %41 = vector.shape_cast %40 : vector<128xf32> to vector<128x1xf32>
      %42 = arith.addf %37, %41 : vector<128x1xf32>
      %c0_26 = arith.constant 0 : index
      %c0_27 = arith.constant 0 : index
      %43 = vector.load %arg11[%c0_26, %c0_27] : memref<128x1xf32, #tpu.memory_space<vmem>>, vector<128x1xf32>
      tpu.vector_store %arg11[%c0_26, %c0_27], %42 {strides = array<i32>} : memref<128x1xf32, #tpu.memory_space<vmem>>, vector<128x1xf32>,
    } else {
    }
    %c0_i32_15 = arith.constant 0 : i32
    %29 = arith.cmpi eq, %arg1, %c0_i32_15 : i32
    %30 = arith.extui %29 : i1 to i32
    %c0_i32_16 = arith.constant 0 : i32
    %31 = arith.cmpi ne, %30, %c0_i32_16 : i32
    scf.if %31 {
      %c0_17 = arith.constant 0 : index
      %c0_18 = arith.constant 0 : index
      %32 = vector.load %arg7[%c0_17, %c0_18] : memref<32x4xbf16, #tpu.memory_space<vmem>>, vector<32x4xbf16>
      %c0_19 = arith.constant 0 : index
      %c0_20 = arith.constant 0 : index
      %33 = vector.load %arg8[%c0_19, %c0_20] : memref<1x4xf32, #tpu.memory_space<vmem>>, vector<1x4xf32>
      %cst_21 = arith.constant dense<0.000000e+00> : vector<128x4xf32>
      %34 = tpu.matmul %3, %32, %cst_21 {dimension_numbers = #tpu.dot_dimension_numbers<[1], [0], [0], [1], [0, 0, 1, 1], [], []>} : vector<128x32xbf16>, vector<32x4xbf16>, vector<128x4xf32> -> vector<128x4xf32>
      %35 = math.exp %34 : vector<128x4xf32>
      %36 = tpu.iota {dimensions = array<i32: 1>} : vector<128x4xi32>
      %37 = vector.broadcast %5 : vector<128x1xi32> to vector<128x4xi32>
      %38 = arith.cmpi eq, %36, %37 : vector<128x4xi32>
      %c-1_i32 = arith.constant -1 : i32
      %39 = vector.broadcast %c-1_i32 : i32 to vector<128x1xi32>
      %40 = arith.cmpi ne, %5, %39 : vector<128x1xi32>
      %cst_22 = arith.constant 0.000000e+00 : f32
      %41 = vector.broadcast %cst_22 : f32 to vector<128x4xf32>
      %42 = arith.select %38, %35, %41 : vector<128x4xi1>, vector<128x4xf32>
      %cst_23 = arith.constant dense<0.000000e+00> : vector<128xf32>
      %43 = vector.multi_reduction <add>, %42, %cst_23 [1] : vector<128x4xf32> to vector<128xf32>
      %44 = vector.shape_cast %43 : vector<128xf32> to vector<128x1xf32>
      %45 = vector.broadcast %33 : vector<1x4xf32> to vector<128x4xf32>
      %46 = arith.mulf %35, %45 : vector<128x4xf32>
      %cst_24 = arith.constant dense<0.000000e+00> : vector<128xf32>
      %47 = vector.multi_reduction <add>, %46, %cst_24 [1] : vector<128x4xf32> to vector<128xf32>
      %48 = vector.shape_cast %47 : vector<128xf32> to vector<128x1xf32>
      %cst_25 = arith.constant 0.000000e+00 : f32
      %49 = vector.shape_cast %33 : vector<1x4xf32> to vector<1x4xf32>
      %50 = vector.broadcast %49 : vector<1x4xf32> to vector<128x4xf32>
      %51 = vector.broadcast %cst_25 : f32 to vector<128x4xf32>
      %52 = arith.select %38, %50, %51 : vector<128x4xi1>, vector<128x4xf32>
      %cst_26 = arith.constant dense<0.000000e+00> : vector<128xf32>
      %53 = vector.multi_reduction <add>, %52, %cst_26 [1] : vector<128x4xf32> to vector<128xf32>
      %54 = vector.shape_cast %53 : vector<128xf32> to vector<128x1xf32>
      %c0_27 = arith.constant 0 : index
      %c0_28 = arith.constant 0 : index
      %55 = vector.load %arg11[%c0_27, %c0_28] : memref<128x1xf32, #tpu.memory_space<vmem>>, vector<128x1xf32>
      %56 = arith.addf %55, %44 : vector<128x1xf32>
      %c0_29 = arith.constant 0 : index
      %c0_30 = arith.constant 0 : index
      %57 = vector.load %arg10[%c0_29, %c0_30] : memref<128x1xf32, #tpu.memory_space<vmem>>, vector<128x1xf32>
      %58 = arith.mulf %57, %54 : vector<128x1xf32>
      %59 = arith.addf %58, %48 : vector<128x1xf32>
      %cst_31 = arith.constant 9.99999996E-13 : f32
      %60 = vector.broadcast %cst_31 : f32 to vector<128x1xf32>
      %61 = arith.addf %59, %60 : vector<128x1xf32>
      %62 = arith.divf %56, %61 : vector<128x1xf32>
      %63 = math.log %62 : vector<128x1xf32>
      %cst_32 = arith.constant 0.000000e+00 : f32
      %64 = vector.broadcast %cst_32 : f32 to vector<128x1xf32>
      %65 = arith.subf %64, %63 : vector<128x1xf32>
      %cst_33 = arith.constant 0.000000e+00 : f32
      %66 = vector.broadcast %cst_33 : f32 to vector<128x1xf32>
      %67 = arith.select %40, %65, %66 : vector<128x1xi1>, vector<128x1xf32>
      %c0_34 = arith.constant 0 : index
      %c0_35 = arith.constant 0 : index
      %68 = vector.load %arg9[%c0_34, %c0_35] : memref<128x1xf32, #tpu.memory_space<vmem>>, vector<128x1xf32>
      tpu.vector_store %arg9[%c0_34, %c0_35], %67 {strides = array<i32>} : memref<128x1xf32, #tpu.memory_space<vmem>>, vector<128x1xf32>,
    } else {
    }
    return
  }
  func.func @transform_0(%arg0: i32, %arg1: i32) -> (i32, i32) {
    %c0_i32 = arith.constant 0 : i32
    %c0_i32_0 = arith.constant 0 : i32
    return %arg0, %c0_i32 : i32, i32
  }
  func.func @transform_1(%arg0: i32, %arg1: i32) -> (i32, i32) {
    %c0_i32 = arith.constant 0 : i32
    %c0_i32_0 = arith.constant 0 : i32
    return %c0_i32, %arg1 : i32, i32
  }
  func.func @transform_2(%arg0: i32, %arg1: i32) -> (i32, i32) {
    %c0_i32 = arith.constant 0 : i32
    %c0_i32_0 = arith.constant 0 : i32
    return %arg0, %c0_i32 : i32, i32
  }
  func.func @transform_3(%arg0: i32, %arg1: i32) -> (i32, i32) {
    %c0_i32 = arith.constant 0 : i32
    %c0_i32_0 = arith.constant 0 : i32
    return %c0_i32, %arg1 : i32, i32
  }
  func.func @transform_4(%arg0: i32, %arg1: i32) -> (i32, i32) {
    %c0_i32 = arith.constant 0 : i32
    %c0_i32_0 = arith.constant 0 : i32
    return %c0_i32, %arg1 : i32, i32
  }
  func.func @transform_5(%arg0: i32, %arg1: i32) -> (i32, i32) {
    %c0_i32 = arith.constant 0 : i32
    %c0_i32_0 = arith.constant 0 : i32
    %c0_i32_1 = arith.constant 0 : i32
    return %c0_i32, %c0_i32_0 : i32, i32
  }
  func.func @transform_6(%arg0: i32, %arg1: i32) -> (i32, i32) {
    %c0_i32 = arith.constant 0 : i32
    %c0_i32_0 = arith.constant 0 : i32
    %c0_i32_1 = arith.constant 0 : i32
    return %c0_i32, %c0_i32_0 : i32, i32
  }
  func.func @transform_7(%arg0: i32, %arg1: i32) -> (i32, i32) {
    %c0_i32 = arith.constant 0 : i32
    %c0_i32_0 = arith.constant 0 : i32
    return %arg0, %c0_i32 : i32, i32
  }
}

</mosaic_0001>

<bundles_post_ra>
// kernel: tpu_custom_call.1
= control target key start
LH: loop header
LB: loop body
LE: loop exit
PB: predicated region body
PF: predicated region fallthrough
CT: control target
= control target key end

     0   :  { %s2477_s24 = smov 0   ;;  %s2479_s25 = smov 0   ;;  %s3798_s0 = inlined_call_operand.vmem [shape: bf16[256,32], index: 0, kind: input, shape index: {}]   ;;  %s3799_s1 = inlined_call_operand.vmem [shape: bf16[32,256], index: 1, kind: input, shape index: {}]   ;;  %s3800_s2 = inlined_call_operand.vmem [shape: s32[256,1], index: 2, kind: input, shape index: {}]   ;;  %s3801_s3 = inlined_call_operand.vmem [shape: s32[1,256], index: 3, kind: input, shape index: {}]   ;;  %s3802_s4 = inlined_call_operand.vmem [shape: f32[1,256], index: 4, kind: input, shape index: {}]   ;;  %s3803_s5 = inlined_call_operand.vmem [shape: bf16[32,4], index: 5, kind: input, shape index: {}]   ;;  %s3804_s6 = inlined_call_operand.vmem [shape: f32[1,4], index: 6, kind: input, shape index: {}]   ;;  %s3805_s7 = inlined_call_operand.vmem [shape: f32[256,1], index: 7, kind: output, shape index: {}]  }
   0x1   :  { %s2481_s26 = smov 0  }
   0x2 LB: > { %s29_s27 = sadd.s32 1, %s2429_s25  ;;  %p2128_p0 = scmp.ge.s32.totalorder %s2433_s26, 1  ;;  %s2433_s26 = sphi %s2481_s26, %s17_s26   ;;  %s2429_s25 = sphi %s2479_s25, %s4135_s25   ;;  %s2425_s24 = sphi %s2477_s24, %s4134_s24  }
   0x3   : > { %p31_p1 = scmp.ge.s32.totalorder %s29_s27, 2  ;;  %p292_p2 = scmp.lt.s32.totalorder %s2433_s26, 3 }
   0x5   : > { %s4137_s27 = smov (%p31_p1, %s29_s27), 0  ;;  %p293_p3 = pnand %p2128_p0, %p292_p2 }
   0x7   : > { %296 = sbr.rel (%p293_p3) target bundleno = 1173 (0x495), region = 48 }
   0xe   : > { %vm3807_vm0 = vcmask 7168   ;;  %v2235_v0 = vld [vmem:[%s3799_s1 + $0x4] ss:$8 sps:$4 sm:$0xff]   ;;  %v2435_v1 = vmov 0.0   ;;  %v2237_v2 = vld [vmem:[%s3799_s1] ss:$8 sps:$4 sm:$0xff]   ;;  %v3808_v30 = vlaneseq }
   0xf   : > { %382 = vst.msk [vmem:[#allocation2] sm:$0xff] %vm3807_vm0, %v2435_v1  ;;  %383 = vst.msk [vmem:[#allocation2 + $0x8] sm:$0xff] %vm3807_vm0, %v2435_v1  ;;  %s2129_s9 = sshll.u32 %s2425_s24, 4  ;;  %537 = vmatprep.subr.bf16.mxu0 %v2235_v0  ;;  %v2238_v3 = vld [vmem:[%s3799_s1 + $0x14] ss:$8 sps:$4 sm:$0xff]   ;;  %v2436_v4 = vmov 0   ;;  %2203 = vmatprep.subr.bf16.mxu1 %v2235_v0 }
  0x10   : > { %384 = vst.msk [vmem:[#allocation2 + $0x10] sm:$0xff] %vm3807_vm0, %v2435_v1  ;;  %385 = vst.msk [vmem:[#allocation2 + $0x18] sm:$0xff] %vm3807_vm0, %v2435_v1  ;;  %569 = vmatprep.mubr.bf16.mxu0 %v2436_v4  ;;  %p343_p4 = scmp.lt.s32.totalorder %s2129_s9, 31  ;;  %538 = vmatpush1.bf16.msra.mxu0 %v2237_v2  ;;  %v2240_v5 = vld [vmem:[%s3799_s1 + $0x10] ss:$8 sps:$4 sm:$0xff]   ;;  %vm3806_vm1 = vcmask 261120  }
  0x11   : > { %386 = vst.msk [vmem:[#allocation2 + $0x20] sm:$0xff] %vm3807_vm0, %v2435_v1  ;;  %387 = vst.msk [vmem:[#allocation2 + $0x28] sm:$0xff] %vm3807_vm0, %v2435_v1  ;;  %539 = vmatprep.subr.bf16.mxu0 %v2238_v3  ;;  %2205 = vmatpush1.bf16.msra.mxu1 %v2237_v2  ;;  %v2672_v31 = vshrl.u32 %v3808_v30, 7  ;;  %v450_v32 = vld [vmem:[%s3801_s3] sm:$0x3]  ;;  %s2700_s8 = sshll.u32 %s2425_s24, 7 }
  0x12   : > { %388 = vst.msk [vmem:[#allocation2 + $0x30] sm:$0xff] %vm3807_vm0, %v2435_v1  ;;  %389 = vst.msk [vmem:[#allocation2 + $0x38] sm:$0xff] %vm3807_vm0, %v2435_v1  ;;  %s4139_s9 = smov (!%p343_p4, %s2129_s9), 31  ;;  %2204 = vmatprep.subr.bf16.mxu1 %v2238_v3  ;;  %629 = vmatprep.mubr.bf16.mxu1 %v2436_v4  ;;  %p848_p5 = scmp.lt.s32.totalorder %s2700_s8, 256  ;;  %v451_v2 = vld [vmem:[%s3802_s4] sm:$0x3] }
  0x13   : > { %390 = vst.msk [vmem:[#allocation2 + $0x40] sm:$0xff] %vm3807_vm0, %v2435_v1  ;;  %391 = vst.msk [vmem:[#allocation2 + $0x48] sm:$0xff] %vm3807_vm0, %v2435_v1  ;;  %s2130_s14 = sshll.u32 %s4139_s9, 2  ;;  %2234 = vset.pattern.permute.xlu1 %v2436_v4  ;;  %2233 = vset.pattern.permute.xlu0 %v2436_v4  ;;  %s2132_s18 = sshll.u32 %s4139_s9, 3  ;;  %v717_v33 = vsub.s32 0, %v2672_v31  ;;  %v721_v34 = vsub.s32 1, %v2672_v31 }
  0x14   : > { %392 = vst.msk [vmem:[#allocation2 + $0x50] sm:$0xff] %vm3807_vm0, %v2435_v1  ;;  %393 = vst.msk [vmem:[#allocation2 + $0x58] sm:$0xff] %vm3807_vm0, %v2435_v1  ;;  %540 = vmatpush1.bf16.msra.mxu0 %v2240_v5  ;;  %s2549_s17 = scalar_lea.vmem %s3798_s0, %s2130_s14  ;;  %s2557_s21 = scalar_lea.vmem %s3805_s7, %s2132_s18 }
  0x15   : > { %394 = vst.msk [vmem:[#allocation2 + $0x60] sm:$0xff] %vm3807_vm0, %v2435_v1  ;;  %395 = vst.msk [vmem:[#allocation2 + $0x68] sm:$0xff] %vm3807_vm0, %v2435_v1  ;;  %v2552_v6 = vld [vmem:[%s2549_s17] sm:$0xff]   ;;  %2206 = vmatpush1.bf16.msra.mxu1 %v2240_v5  ;;  %v2563_v7 = vld [vmem:[%s2549_s17 + $0x30] sm:$0xff]   ;;  %s2568_s28 = scalar_lea.vmem %s3800_s2, %s2132_s18  ;;  %v2681_v35 = vrot.slane %v450_v32, %v717_v33  ;;  %v2685_v36 = vrot.slane %v450_v32, %v721_v34  ;;  %s2172_s9 = sadd.s32 128, %s2700_s8 }
  0x16   : > { %396 = vst.msk [vmem:[#allocation2 + $0x70] sm:$0xff] %vm3807_vm0, %v2435_v1  ;;  %397 = vst.msk [vmem:[#allocation2 + $0x78] sm:$0xff] %vm3807_vm0, %v2435_v1  ;;  %v2571_v8 = vld [vmem:[%s2549_s17 + $0x8] sm:$0xff]   ;;  %v2577_v9 = vld [vmem:[%s2568_s28 + $0x10] sm:$0xff]  ;;  %p2157_p6 = scmp.gt.s32.totalorder %s2172_s9, 0 }
  0x17   : > { %398 = vst.msk [vmem:[#allocation3] sm:$0xff] %vm3807_vm0, %v2435_v1  ;;  %399 = vst.msk [vmem:[#allocation3 + $0x8] sm:$0xff] %vm3807_vm0, %v2435_v1  ;;  %2147 = vmatmul.mubr.msk.bf16.vlgmr.msra.gmra.mrb[0].mxu0 %vm3806_vm1, %v2552_v6  ;;  %v2580_v10 = vld [vmem:[%s2568_s28] sm:$0xff]  ;;  %764 = vperm.xlu1 %2234, %v2577_v9   ;;  %v2587_v11 = vld [vmem:[%s2549_s17 + $0x38] sm:$0xff]  }
  0x18   : > { %400 = vst.msk [vmem:[#allocation3 + $0x10] sm:$0xff] %vm3807_vm0, %v2435_v1  ;;  %401 = vst.msk [vmem:[#allocation3 + $0x18] sm:$0xff] %vm3807_vm0, %v2435_v1  ;;  %579 = vmatprep.mubr.bf16.mxu0 %v2436_v4  ;;  %2153 = vmatmul.mubr.msk.bf16.vlgmr.msra.gmra.mrb[0].mxu1 %vm3806_vm1, %v2563_v7  ;;  %v2590_v12 = vld [vmem:[%s2568_s28 + $0x18] sm:$0xff]  ;;  %v2593_v13 = vld [vmem:[%s2568_s28 + $0x8] sm:$0xff]  ;;  %p2716_p7 = pnand %p2157_p6, %p848_p5 }
  0x19   : > { %402 = vst.msk [vmem:[#allocation3 + $0x20] sm:$0xff] %vm3807_vm0, %v2435_v1  ;;  %403 = vst.msk [vmem:[#allocation3 + $0x28] sm:$0xff] %vm3807_vm0, %v2435_v1  ;;  %639 = vmatprep.mubr.bf16.mxu1 %v2436_v4  ;;  %758 = vperm.xlu0 %2233, %v2580_v10   ;;  %v2599_v14 = vld [vmem:[%s2549_s17 + $0x10] sm:$0xff]   ;;  %v2604_v15 = vld [vmem:[%s2568_s28 + $0x28] sm:$0xff] }
  0x1a   : > { %404 = vst.msk [vmem:[#allocation3 + $0x30] sm:$0xff] %vm3807_vm0, %v2435_v1  ;;  %405 = vst.msk [vmem:[#allocation3 + $0x38] sm:$0xff] %vm3807_vm0, %v2435_v1  ;;  %v2607_v16 = vld [vmem:[%s2568_s28 + $0x20] sm:$0xff]  ;;  %v2614_v17 = vld [vmem:[%s2568_s28 + $0x38] sm:$0xff] }
  0x1b   : > { %406 = vst.msk [vmem:[#allocation3 + $0x40] sm:$0xff] %vm3807_vm0, %v2435_v1  ;;  %407 = vst.msk [vmem:[#allocation3 + $0x48] sm:$0xff] %vm3807_vm0, %v2435_v1  ;;  %767 = vperm.xlu1 %2234, %v2590_v12   ;;  %v2617_v18 = vld [vmem:[%s2568_s28 + $0x30] sm:$0xff]  ;;  %v2623_v19 = vld [vmem:[%s2549_s17 + $0x18] sm:$0xff]  }
  0x1c   : > { %408 = vst.msk [vmem:[#allocation3 + $0x50] sm:$0xff] %vm3807_vm0, %v2435_v1  ;;  %409 = vst.msk [vmem:[#allocation3 + $0x58] sm:$0xff] %vm3807_vm0, %v2435_v1  ;;  %v2626_v20 = vld [vmem:[%s2568_s28 + $0x48] sm:$0xff]  ;;  %v2629_v21 = vld [vmem:[%s2568_s28 + $0x40] sm:$0xff] }
  0x1d   : > { %410 = vst.msk [vmem:[#allocation3 + $0x60] sm:$0xff] %vm3807_vm0, %v2435_v1  ;;  %411 = vst.msk [vmem:[#allocation3 + $0x68] sm:$0xff] %vm3807_vm0, %v2435_v1  ;;  %761 = vperm.xlu0 %2233, %v2593_v13   ;;  %v2636_v22 = vld [vmem:[%s2568_s28 + $0x58] sm:$0xff]  ;;  %v2639_v23 = vld [vmem:[%s2568_s28 + $0x50] sm:$0xff] }
  0x1e   : > { %412 = vst.msk [vmem:[#allocation3 + $0x70] sm:$0xff] %vm3807_vm0, %v2435_v1  ;;  %413 = vst.msk [vmem:[#allocation3 + $0x78] sm:$0xff] %vm3807_vm0, %v2435_v1  ;;  %v2645_v24 = vld [vmem:[%s2549_s17 + $0x20] sm:$0xff]   ;;  %v2648_v25 = vld [vmem:[%s2568_s28 + $0x68] sm:$0xff] }
  0x1f   : > { %3898 = vst [vmem:[#allocation4_spill] sm:$0xff] %v2552_v6  ;;  %3899 = vst [vmem:[#allocation5_spill] sm:$0xff] %v2563_v7  ;;  %2148 = vmatmul.mubr.msk.bf16.gmra.mrb[4].mxu0 %vm3806_vm1, %v2571_v8  ;;  %773 = vperm.xlu1 %2234, %v2604_v15   ;;  %v2651_v26 = vld [vmem:[%s2568_s28 + $0x60] sm:$0xff]  ;;  %v2658_v27 = vld [vmem:[%s2568_s28 + $0x78] sm:$0xff] }
  0x20   : > { %3900 = vst [vmem:[#allocation6_spill] sm:$0xff] %v2571_v8  ;;  %3901 = vst [vmem:[#allocation7_spill] sm:$0xff] %v2577_v9  ;;  %589 = vmatprep.mubr.bf16.mxu0 %v2436_v4  ;;  %2154 = vmatmul.mubr.msk.bf16.gmra.mrb[4].mxu1 %vm3806_vm1, %v2587_v11  ;;  %v2661_v28 = vld [vmem:[%s2568_s28 + $0x70] sm:$0xff]  ;;  %v2667_v29 = vld [vmem:[%s2549_s17 + $0x28] sm:$0xff]  }
  0x21   : > { %3902 = vst [vmem:[#allocation8_spill] sm:$0xff] %v2580_v10  ;;  %3903 = vst [vmem:[#allocation9_spill] sm:$0xff] %v2587_v11  ;;  %770 = vperm.xlu0 %2233, %v2607_v16  }
  0x22   : > { %3904 = vst [vmem:[#allocation10_spill] sm:$0xff] %v2590_v12  ;;  %3905 = vst [vmem:[#allocation11_spill] sm:$0xff] %v2593_v13 }
  0x23   : > { %3906 = vst [vmem:[#allocation12_spill] sm:$0xff] %v2599_v14  ;;  %3907 = vst [vmem:[#allocation13_spill] sm:$0xff] %v2604_v15  ;;  %779 = vperm.xlu1 %2234, %v2614_v17  }
  0x24   : > { %3908 = vst [vmem:[#allocation14_spill] sm:$0xff] %v2607_v16  ;;  %3909 = vst [vmem:[#allocation15_spill] sm:$0xff] %v2614_v17 }
  0x25   : > { %3910 = vst [vmem:[#allocation16_spill] sm:$0xff] %v2617_v18  ;;  %776 = vperm.xlu0 %2233, %v2617_v18   ;;  %3911 = vst [vmem:[#allocation17_spill] sm:$0xff] %v2623_v19 }
  0x26   : > { %3912 = vst [vmem:[#allocation18_spill] sm:$0xff] %v2626_v20  ;;  %3913 = vst [vmem:[#allocation19_spill] sm:$0xff] %v2629_v21 }
  0x27   : > { %2149 = vmatmul.mubr.msk.bf16.gmra.mrb[8].mxu0 %vm3806_vm1, %v2599_v14  ;;  %785 = vperm.xlu1 %2234, %v2626_v20   ;;  %3914 = vst [vmem:[#allocation20_spill] sm:$0xff] %v2636_v22  ;;  %3915 = vst [vmem:[#allocation21_spill] sm:$0xff] %v2639_v23  ;;  %v862_v14 = vadd.s32 (!%p2716_p7), 32, %v2672_v31 }
  0x28   : > { %599 = vmatprep.mubr.bf16.mxu0 %v2436_v4  ;;  %3916 = vst [vmem:[#allocation22_spill] sm:$0xff] %v2645_v24  ;;  %3917 = vst [vmem:[#allocation23_spill] sm:$0xff] %v2648_v25 }
  0x29   : > { %782 = vperm.xlu0 %2233, %v2629_v21   ;;  %3918 = vst [vmem:[#allocation24_spill] sm:$0xff] %v2651_v26  ;;  %3919 = vst [vmem:[#allocation25_spill] sm:$0xff] %v2658_v27 }
  0x2a   : > { %3920 = vst [vmem:[#allocation26_spill] sm:$0xff] %v2661_v28  ;;  %3921 = vst [vmem:[#allocation27_spill] sm:$0xff] %v2667_v29 }
  0x2b   : > { %791 = vperm.xlu1 %2234, %v2636_v22  }
  0x2d   : > { %788 = vperm.xlu0 %2233, %v2639_v23  }
  0x2f   : > { %2150 = vmatmul.mubr.msk.bf16.gmra.mrb[12].mxu0 %vm3806_vm1, %v2623_v19  ;;  %797 = vperm.xlu1 %2234, %v2648_v25  }
  0x30   : > { %609 = vmatprep.mubr.bf16.mxu0 %v2436_v4 }
  0x31   : > { %794 = vperm.xlu0 %2233, %v2651_v26  }
  0x33   : > { %803 = vperm.xlu1 %2234, %v2658_v27  }
  0x35   : > { %800 = vperm.xlu0 %2233, %v2661_v28  }
  0x37   : > { %2151 = vmatmul.mubr.msk.bf16.gmra.mrb[16].mxu0 %vm3806_vm1, %v2645_v24  ;;  %v860_v24 = vadd.s32 (!%p2716_p7), 16, %v2672_v31 }
  0x38   : > { %619 = vmatprep.mubr.bf16.mxu0 %v2436_v4 }
  0x3f   : > { %2152 = vmatmul.mubr.msk.bf16.gmra.mrb[20].mxu0 %vm3806_vm1, %v2667_v29 }
  0x96   : > { %v2687_v37 = vpop.permute.xlu1 %764 }
  0x97   : > { %vm817_vm2 = vcmp.eq.s32.totalorder %v2687_v37, %v2681_v35  ;;  %vm818_vm3 = vcmp.eq.s32.totalorder %v2687_v37, %v2685_v36 }
  0x98   : > { %v2689_v38 = vpop.permute.xlu0 %758 }
  0x99   : > { %vm813_vm4 = vcmp.eq.s32.totalorder %v2689_v38, %v2681_v35  ;;  %vm814_vm5 = vcmp.eq.s32.totalorder %v2689_v38, %v2685_v36 }
  0x9a   : > { %v2703_v39 = vpop.permute.xlu1 %767 }
  0x9b   : > { %vm819_vm6 = vcmp.eq.s32.totalorder %v2703_v39, %v2681_v35  ;;  %vm820_vm7 = vcmp.eq.s32.totalorder %v2703_v39, %v2685_v36 }
  0x9c   : > { %v2705_v40 = vpop.permute.xlu0 %761 }
  0x9d   : > { %vm815_vm8 = vcmp.eq.s32.totalorder %v2705_v40, %v2681_v35  ;;  %vm816_vm9 = vcmp.eq.s32.totalorder %v2705_v40, %v2685_v36 }
  0x9e   : > { %v2720_v41 = vpop.permute.xlu1 %773 }
  0x9f   : > { %vm823_vm10 = vcmp.eq.s32.totalorder %v2720_v41, %v2681_v35  ;;  %vm824_vm11 = vcmp.eq.s32.totalorder %v2720_v41, %v2685_v36 }
  0xa0   : > { %v2722_v42 = vpop.permute.xlu0 %770 }
  0xa2   : > { %v2732_v43 = vpop.permute.xlu1 %779 }
  0xa4   : > { %v2734_v44 = vpop.permute.xlu0 %776 }
  0xa6   : > { %v2744_v45 = vpop.permute.xlu1 %785 }
  0xa8   : > { %v2746_v46 = vpop.permute.xlu0 %782 }
  0xaa   : > { %v2756_v47 = vpop.permute.xlu1 %791 }
  0xac   : > { %v2758_v48 = vpop.permute.xlu0 %788 }
  0xae   : > { %v2768_v49 = vpop.permute.xlu1 %797 }
  0xaf   : > { %3923 = vst [vmem:[#allocation28_spill] sm:$0xff] %v2768_v49 }
  0xb0   : > { %v2770_v50 = vpop.permute.xlu0 %794 }
  0xb1   : > { %3924 = vst [vmem:[#allocation29_spill] sm:$0xff] %v2770_v50 }
  0xb2   : > { %v2780_v51 = vpop.permute.xlu1 %803 }
  0xb3   : > { %3925 = vst [vmem:[#allocation30_spill] sm:$0xff] %v2780_v51 }
  0xb4   : > { %v2782_v52 = vpop.permute.xlu0 %800 }
  0xb5   : > { %3926 = vst [vmem:[#allocation31_spill] sm:$0xff] %v2782_v52 }
  0xea   : > { %v571_v53 = vpop.f32.mrb[0].mxu0 }
  0xeb   : > { %v650_v54 = vmul.f32 1.442695, %v571_v53  ;;  %v573_v55 = vpop.f32.mrb[1].mxu0  ;;  %v631_v61 = vpop.f32.mrb[0].mxu1 }
  0xec   : > { %v652_v56 = vmul.f32 1.442695, %v573_v55  ;;  %v575_v57 = vpop.f32.mrb[2].mxu0  ;;  %v698_v62 = vmul.f32 1.442695, %v631_v61  ;;  %v633_v63 = vpop.f32.mrb[1].mxu1  ;;  %v2797_v55 = vrot.slane %v451_v2, %v717_v33 }
  0xed   : > { %2249 = vpow2.f32 %v650_v54  ;;  %v654_v58 = vmul.f32 1.442695, %v575_v57  ;;  %v577_v59 = vpop.f32.mrb[3].mxu0  ;;  %v700_v0 = vmul.f32 1.442695, %v633_v63  ;;  %v635_v1 = vpop.f32.mrb[2].mxu1 }
  0xee   : > { %2251 = vpow2.f32 %v652_v56  ;;  %v656_v60 = vmul.f32 1.442695, %v577_v59  ;;  %v702_v3 = vmul.f32 1.442695, %v635_v1  ;;  %v637_v4 = vpop.f32.mrb[3].mxu1 }
  0xef   : > { %2253 = vpow2.f32 %v654_v58  ;;  %v704_v32 = vmul.f32 1.442695, %v637_v4  ;;  %v2801_v58 = vrot.slane %v451_v2, %v721_v34 }
  0xf0   : > { %2255 = vpow2.f32 %v656_v60 }
  0xf1   : > { %2257 = vpow2.f32 %v698_v62 }
  0xf2   : > { %v581_v5 = vpop.f32.mrb[4].mxu0  ;;  %2259 = vpow2.f32 %v700_v0 }
  0xf3   : > { %v658_v53 = vmul.f32 1.442695, %v581_v5  ;;  %v583_v54 = vpop.f32.mrb[5].mxu0  ;;  %2261 = vpow2.f32 %v702_v3  ;;  %v641_v62 = vpop.f32.mrb[4].mxu1 }
  0xf4   : > { %v660_v56 = vmul.f32 1.442695, %v583_v54  ;;  %v585_v57 = vpop.f32.mrb[6].mxu0  ;;  %2263 = vpow2.f32 %v704_v32  ;;  %v706_v0 = vmul.f32 1.442695, %v641_v62  ;;  %v643_v1 = vpop.f32.mrb[5].mxu1 }
  0xf5   : > { %2265 = vpow2.f32 %v658_v53  ;;  %v662_v59 = vmul.f32 1.442695, %v585_v57  ;;  %v587_v60 = vpop.f32.mrb[7].mxu0  ;;  %v708_v4 = vmul.f32 1.442695, %v643_v1  ;;  %v645_v5 = vpop.f32.mrb[6].mxu1 }
  0xf6   : > { %2267 = vpow2.f32 %v660_v56  ;;  %v664_v61 = vmul.f32 1.442695, %v587_v60  ;;  %v710_v2 = vmul.f32 1.442695, %v645_v5  ;;  %v647_v53 = vpop.f32.mrb[7].mxu1 }
  0xf7   : > { %v2250_v63 = vpop.eup %2249  ;;  %2269 = vpow2.f32 %v662_v59  ;;  %v712_v59 = vmul.f32 1.442695, %v647_v53 }
  0xf8   : > { %v2252_v3 = vpop.eup %2251  ;;  %v2804_v33 = vmul.f32 %v2250_v63, %v2797_v55  ;;  %2271 = vpow2.f32 %v664_v61 }
  0xf9   : > { %v2254_v32 = vpop.eup %2253  ;;  %v2807_v34 = vmul.f32 %v2252_v3, %v2801_v58  ;;  %2273 = vpow2.f32 %v706_v0 }
  0xfa   : > { %3927 = vst [vmem:[#allocation32_spill] sm:$0xff] %v2804_v33  ;;  %v2256_v54 = vpop.eup %2255  ;;  %v2810_v56 = vmul.f32 %v2254_v32, %v2797_v55  ;;  %v591_v57 = vpop.f32.mrb[8].mxu0  ;;  %2275 = vpow2.f32 %v708_v4 }
  0xfb   : > { %3928 = vst [vmem:[#allocation33_spill] sm:$0xff] %v2807_v34  ;;  %v2258_v60 = vpop.eup %2257  ;;  %v2813_v62 = vmul.f32 %v2256_v54, %v2801_v58  ;;  %v666_v61 = vmul.f32 1.442695, %v591_v57  ;;  %v593_v63 = vpop.f32.mrb[9].mxu0  ;;  %2277 = vpow2.f32 %v710_v2 }
  0xfc   : > { %3929 = vst [vmem:[#allocation34_spill] sm:$0xff] %v2810_v56  ;;  %v2260_v1 = vpop.eup %2259  ;;  %v668_v3 = vmul.f32 1.442695, %v593_v63  ;;  %v595_v30 = vpop.f32.mrb[10].mxu0  ;;  %v2816_v0 = vmul.f32 %v2258_v60, %v2797_v55  ;;  %2279 = vpow2.f32 %v712_v59 }
  0xfd   : > { %3930 = vst [vmem:[#allocation35_spill] sm:$0xff] %v2813_v62  ;;  %v2262_v5 = vpop.eup %2261  ;;  %2281 = vpow2.f32 %v666_v61  ;;  %v670_v32 = vmul.f32 1.442695, %v595_v30  ;;  %v597_v27 = vpop.f32.mrb[11].mxu0  ;;  %v2819_v4 = vmul.f32 %v2260_v1, %v2801_v58 }
  0xfe   : > { %v2264_v53 = vpop.eup %2263  ;;  %2283 = vpow2.f32 %v668_v3  ;;  %v672_v54 = vmul.f32 1.442695, %v597_v27  ;;  %v2822_v57 = vmul.f32 %v2262_v5, %v2797_v55 }
  0xff   : > { %v2266_v2 = vpop.eup %2265  ;;  %2285 = vpow2.f32 %v670_v32  ;;  %v2825_v63 = vmul.f32 %v2264_v53, %v2801_v58 }
 0x100   : > { %v2268_v60 = vpop.eup %2267  ;;  %v2828_v59 = vmul.f32 %v2266_v2, %v2797_v55  ;;  %2287 = vpow2.f32 %v672_v54 }
 0x101   : > { %v2270_v30 = vpop.eup %2269  ;;  %v2831_v61 = vmul.f32 %v2268_v60, %v2801_v58 }
 0x102   : > { %3931 = vst [vmem:[#allocation36_spill] sm:$0xff] %v2828_v59  ;;  %v2272_v1 = vpop.eup %2271  ;;  %v2834_v27 = vmul.f32 %v2270_v30, %v2797_v55  ;;  %v601_v3 = vpop.f32.mrb[12].mxu0 }
 0x103   : > { %3932 = vst [vmem:[#allocation37_spill] sm:$0xff] %v2831_v61  ;;  %v2274_v5 = vpop.eup %2273  ;;  %v2837_v32 = vmul.f32 %v2272_v1, %v2801_v58  ;;  %v674_v53 = vmul.f32 1.442695, %v601_v3  ;;  %v603_v28 = vpop.f32.mrb[13].mxu0 }
 0x104   : > { %3933 = vst [vmem:[#allocation38_spill] sm:$0xff] %v2834_v27  ;;  %v2276_v25 = vpop.eup %2275  ;;  %v676_v26 = vmul.f32 1.442695, %v603_v28  ;;  %v605_v2 = vpop.f32.mrb[14].mxu0  ;;  %v2840_v54 = vmul.f32 %v2274_v5, %v2797_v55 }
 0x105   : > { %3934 = vst [vmem:[#allocation39_spill] sm:$0xff] %v2837_v32  ;;  %v2278_v22 = vpop.eup %2277  ;;  %2289 = vpow2.f32 %v674_v53  ;;  %v678_v60 = vmul.f32 1.442695, %v605_v2  ;;  %v607_v23 = vpop.f32.mrb[15].mxu0  ;;  %v2843_v30 = vmul.f32 %v2276_v25, %v2801_v58 }
 0x106   : > { %v2280_v20 = vpop.eup %2279  ;;  %2291 = vpow2.f32 %v676_v26  ;;  %v680_v21 = vmul.f32 1.442695, %v607_v23  ;;  %v2846_v1 = vmul.f32 %v2278_v22, %v2797_v55 }
 0x107   : > { %3935 = vst [vmem:[#allocation40_spill] sm:$0xff] %v2843_v30  ;;  %v2282_v3 = vpop.eup %2281  ;;  %2293 = vpow2.f32 %v678_v60  ;;  %v2849_v28 = vmul.f32 %v2280_v20, %v2801_v58 }
 0x108   : > { %v2284_v5 = vpop.eup %2283  ;;  %v2852_v15 = vmul.f32 %v2282_v3, %v2797_v55  ;;  %2295 = vpow2.f32 %v680_v21 }
 0x109   : > { %v2286_v53 = vpop.eup %2285  ;;  %v2855_v25 = vmul.f32 %v2284_v5, %v2801_v58 }
 0x10a   : > { %3936 = vst [vmem:[#allocation41_spill] sm:$0xff] %v2852_v15  ;;  %v2288_v2 = vpop.eup %2287  ;;  %v2858_v23 = vmul.f32 %v2286_v53, %v2797_v55  ;;  %v611_v22 = vpop.f32.mrb[16].mxu0 }
 0x10b   : > { %3937 = vst [vmem:[#allocation42_spill] sm:$0xff] %v2855_v25  ;;  %v2861_v26 = vmul.f32 %v2288_v2, %v2801_v58  ;;  %v682_v60 = vmul.f32 1.442695, %v611_v22  ;;  %v613_v20 = vpop.f32.mrb[17].mxu0 }
 0x10c   : > { %3938 = vst [vmem:[#allocation43_spill] sm:$0xff] %v2858_v23  ;;  %v684_v16 = vmul.f32 1.442695, %v613_v20  ;;  %v615_v17 = vpop.f32.mrb[18].mxu0 }
 0x10d   : > { %3939 = vst [vmem:[#allocation44_spill] sm:$0xff] %v2861_v26  ;;  %2297 = vpow2.f32 %v682_v60  ;;  %v686_v3 = vmul.f32 1.442695, %v615_v17  ;;  %v617_v18 = vpop.f32.mrb[19].mxu0 }
 0x10e   : > { %2299 = vpow2.f32 %v684_v16  ;;  %v688_v21 = vmul.f32 1.442695, %v617_v18 }
 0x10f   : > { %v2290_v13 = vpop.eup %2289  ;;  %2301 = vpow2.f32 %v686_v3 }
 0x110   : > { %v2292_v5 = vpop.eup %2291  ;;  %v2864_v10 = vmul.f32 %v2290_v13, %v2797_v55  ;;  %2303 = vpow2.f32 %v688_v21 }
 0x111   : > { %v2294_v53 = vpop.eup %2293  ;;  %v2867_v2 = vmul.f32 %v2292_v5, %v2801_v58 }
 0x112   : > { %v2296_v22 = vpop.eup %2295  ;;  %v2870_v20 = vmul.f32 %v2294_v53, %v2797_v55  ;;  %v621_v60 = vpop.f32.mrb[20].mxu0 }
 0x113   : > { %3940 = vst [vmem:[#allocation45_spill] sm:$0xff] %v2867_v2  ;;  %v2873_v17 = vmul.f32 %v2296_v22, %v2801_v58  ;;  %v690_v16 = vmul.f32 1.442695, %v621_v60  ;;  %v623_v18 = vpop.f32.mrb[21].mxu0 }
 0x114   : > { %v692_v3 = vmul.f32 1.442695, %v623_v18  ;;  %v625_v12 = vpop.f32.mrb[22].mxu0 }
 0x115   : > { %3941 = vst [vmem:[#allocation46_spill] sm:$0xff] %v2873_v17  ;;  %2305 = vpow2.f32 %v690_v16  ;;  %v694_v13 = vmul.f32 1.442695, %v625_v12  ;;  %v627_v9 = vpop.f32.mrb[23].mxu0 }
 0x116   : > { %2307 = vpow2.f32 %v692_v3  ;;  %v696_v21 = vmul.f32 1.442695, %v627_v9 }
 0x117   : > { %v2298_v11 = vpop.eup %2297  ;;  %2309 = vpow2.f32 %v694_v13 }
 0x118   : > { %v2300_v5 = vpop.eup %2299  ;;  %v2876_v7 = vmul.f32 %v2298_v11, %v2797_v55  ;;  %2311 = vpow2.f32 %v696_v21 }
 0x119   : > { %v2302_v53 = vpop.eup %2301  ;;  %v2879_v22 = vmul.f32 %v2300_v5, %v2801_v58 }
 0x11a   : > { %3942 = vst [vmem:[#allocation47_spill] sm:$0xff] %v2876_v7  ;;  %v2304_v60 = vpop.eup %2303  ;;  %v2882_v18 = vmul.f32 %v2302_v53, %v2797_v55  ;;  %v2902_v53 = vstv (!%p2716_p7), %s2700_s8 }
 0x11b   : > { %3943 = vst [vmem:[#allocation48_spill] sm:$0xff] %v2879_v22  ;;  %v2885_v12 = vmul.f32 %v2304_v60, %v2801_v58  ;;  %v3949_v60 = vlaneseq (!%p2716_p7)  ;;  %v877_v19 = vadd.s32 (!%p2716_p7), %v2902_v53, %v860_v24 }
 0x11c   : > { %3944 = vst [vmem:[#allocation49_spill] sm:$0xff] %v2882_v18 }
 0x11d   : > { %3945 = vst [vmem:[#allocation50_spill] sm:$0xff] %v2885_v12 }
 0x11f   : > { %v2306_v16 = vpop.eup %2305  ;;  %856 = sbr.rel (%p2716_p7) target bundleno = 503 (0x1f7), region = 56 }
 0x120   : > { %v2308_v9 = vpop.eup %2307  ;;  %v2888_v3 = vmul.f32 %v2306_v16, %v2797_v55  ;;  %v2905_v16 = vand.u32 (!%p2716_p7), 127, %v3949_v60 }
 0x121   : > { %v2310_v13 = vpop.eup %2309  ;;  %v2891_v11 = vmul.f32 %v2308_v9, %v2801_v58  ;;  %v861_v9 = vadd.s32 (!%p2716_p7), 24, %v2672_v31 }
 0x122   : > { %3946 = vst [vmem:[#allocation51_spill] sm:$0xff] %v2888_v3  ;;  %v2312_v21 = vpop.eup %2311  ;;  %v2894_v5 = vmul.f32 %v2310_v13, %v2797_v55  ;;  %v875_v55 = vadd.s32 (!%p2716_p7), %v2902_v53, %v2672_v31  ;;  %v859_v13 = vadd.s32 (!%p2716_p7), 8, %v2672_v31  ;;  %vm901_vm13 = vcmp.eq.s32.totalorder (!%p2716_p7), %v877_v19, %v2905_v16 }
 0x123   : > { %3947 = vst [vmem:[#allocation52_spill] sm:$0xff] %v2891_v11  ;;  %v2897_v29 = vmul.f32 %v2312_v21, %v2801_v58  ;;  %v863_v58 = vadd.s32 (!%p2716_p7), 40, %v2672_v31  ;;  %v2914_v21 = vadd.s32 (!%p2716_p7), 128, %v2905_v16  ;;  %v878_v60 = vadd.s32 (!%p2716_p7), %v2902_v53, %v861_v9 }
 0x124   : > { %vm897_vm14 = vcmp.eq.s32.totalorder (!%p2716_p7), %v875_v55, %v2905_v16  ;;  %v876_v8 = vadd.s32 (!%p2716_p7), %v2902_v53, %v859_v13  ;;  %v2931_v24 = vsel (!%p2716_p7), %vm901_vm13, 0.0, %v2828_v59 }
 0x125   : > { %3948 = vst [vmem:[#allocation53_spill] sm:$0xff] %v2897_v29  ;;  %vm898_vm15 = vcmp.eq.s32.totalorder (!%p2716_p7), %v875_v55, %v2914_v21  ;;  %v2923_v6 = vsel (!%p2716_p7), %vm897_vm14, 0.0, %v2804_v33  ;;  %vm902_vm12 = vcmp.eq.s32.totalorder (!%p2716_p7), %v877_v19, %v2914_v21  ;;  %v880_v9 = vadd.s32 (!%p2716_p7), %v2902_v53, %v863_v58 }
 0x126   : > { %v2928_v52 = vsel %vm898_vm15, 0.0, %v2807_v34  ;;  %v2934_v51 = vsel %vm902_vm12, 0.0, %v2831_v61  ;;  %v879_v33 = vadd.s32 %v2902_v53, %v862_v14  ;;  %vm903_vm14 = vcmp.eq.s32.totalorder %v878_v60, %v2905_v16 }
 0x127   : > { %v977_v55 = vadd.f32 %v2928_v52, %v2923_v6  ;;  %v983_v13 = vadd.f32 %v2934_v51, %v2931_v24  ;;  %vm904_vm15 = vcmp.eq.s32.totalorder %v878_v60, %v2914_v21  ;;  %vm899_vm13 = vcmp.eq.s32.totalorder %v876_v8, %v2905_v16 }
 0x128   : > { %v865_v19 = vadd.s32 56, %v2672_v31  ;;  %v2947_v58 = vsel %vm903_vm14, 0.0, %v2834_v27  ;;  %v2950_v34 = vsel %vm904_vm15, 0.0, %v2837_v32  ;;  %vm900_vm12 = vcmp.eq.s32.totalorder %v876_v8, %v2914_v21 }
 0x129   : > { %978 = vadd.xlane.f32.xlu0 %v977_v55  ;;  %984 = vadd.xlane.f32.xlu1 %v983_v13  ;;  %v2954_v14 = vsel %vm899_vm13, 0.0, %v2810_v56  ;;  %v986_v60 = vadd.f32 %v2950_v34, %v2947_v58  ;;  %v2959_v61 = vsel %vm900_vm12, 0.0, %v2813_v62  ;;  %vm907_vm1 = vcmp.eq.s32.totalorder %v880_v9, %v2905_v16 }
 0x12a   : > { %vm908_vm0 = vcmp.eq.s32.totalorder %v880_v9, %v2914_v21  ;;  %v980_v55 = vadd.f32 %v2959_v61, %v2954_v14  ;;  %v2966_v13 = vsel %vm907_vm1, 0.0, %v2858_v23  ;;  %vm905_vm14 = vcmp.eq.s32.totalorder %v879_v33, %v2905_v16 }
 0x12b   : > { %v2969_v8 = vsel %vm908_vm0, 0.0, %v2861_v26  ;;  %vm906_vm15 = vcmp.eq.s32.totalorder %v879_v33, %v2914_v21  ;;  %v2976_v62 = vsel %vm905_vm14, 0.0, %v2852_v15  ;;  %v882_v9 = vadd.s32 %v2902_v53, %v865_v19 }
 0x12c   : > { %v992_v56 = vadd.f32 %v2969_v8, %v2966_v13  ;;  %v2980_v23 = vsel %vm906_vm15, 0.0, %v2855_v25  ;;  %v864_v26 = vadd.s32 48, %v2672_v31  ;;  %v867_v32 = vadd.s32 72, %v2672_v31 }
 0x12d   : > { %987 = vadd.xlane.f32.xlu1 %v986_v60  ;;  %981 = vadd.xlane.f32.xlu0 %v980_v55  ;;  %v866_v27 = vadd.s32 64, %v2672_v31  ;;  %v989_v59 = vadd.f32 %v2980_v23, %v2976_v62  ;;  %vm911_vm0 = vcmp.eq.s32.totalorder %v882_v9, %v2905_v16  ;;  %vm912_vm1 = vcmp.eq.s32.totalorder %v882_v9, %v2914_v21 }
 0x12e   : > { %v869_v33 = vadd.s32 88, %v2672_v31  ;;  %v2991_v19 = vsel %vm911_vm0, 0.0, %v2870_v20  ;;  %v2994_v60 = vsel %vm912_vm1, 0.0, %v2873_v17  ;;  %v881_v55 = vadd.s32 %v2902_v53, %v864_v26 }
 0x12f   : > { %v884_v25 = vadd.s32 %v2902_v53, %v867_v32  ;;  %v998_v15 = vadd.f32 %v2994_v60, %v2991_v19  ;;  %v883_v50 = vadd.s32 %v2902_v53, %v866_v27  ;;  %v868_v9 = vadd.s32 80, %v2672_v31 }
 0x130   : > { %v886_v49 = vadd.s32 %v2902_v53, %v869_v33  ;;  %vm909_vm13 = vcmp.eq.s32.totalorder %v881_v55, %v2905_v16  ;;  %vm910_vm12 = vcmp.eq.s32.totalorder %v881_v55, %v2914_v21  ;;  %v871_v26 = vadd.s32 104, %v2672_v31 }
 0x131   : > { %993 = vadd.xlane.f32.xlu1 %v992_v56  ;;  %990 = vadd.xlane.f32.xlu0 %v989_v59  ;;  %vm915_vm14 = vcmp.eq.s32.totalorder %v884_v25, %v2905_v16  ;;  %v3008_v32 = vsel %vm909_vm13, 0.0, %v2864_v10  ;;  %v3011_v17 = vsel %vm910_vm12, 0.0, %v2867_v2  ;;  %vm916_vm15 = vcmp.eq.s32.totalorder %v884_v25, %v2914_v21 }
 0x132   : > { %v3015_v27 = vsel %vm915_vm14, 0.0, %v2882_v18  ;;  %v995_v56 = vadd.f32 %v3011_v17, %v3008_v32  ;;  %v3020_v59 = vsel %vm916_vm15, 0.0, %v2885_v12  ;;  %vm913_vm0 = vcmp.eq.s32.totalorder %v883_v50, %v2905_v16 }
 0x133   : > { %vm914_vm1 = vcmp.eq.s32.totalorder %v883_v50, %v2914_v21  ;;  %v1004_v33 = vadd.f32 %v3020_v59, %v3015_v27  ;;  %v3027_v55 = vsel %vm913_vm0, 0.0, %v2876_v7  ;;  %vm919_vm13 = vcmp.eq.s32.totalorder %v886_v49, %v2905_v16 }
 0x134   : > { %v3030_v25 = vsel %vm914_vm1, 0.0, %v2879_v22  ;;  %vm920_vm12 = vcmp.eq.s32.totalorder %v886_v49, %v2914_v21  ;;  %v3037_v50 = vsel %vm919_vm13, 0.0, %v2894_v5  ;;  %v885_v18 = vadd.s32 %v2902_v53, %v868_v9 }
 0x135   : > { %999 = vadd.xlane.f32.xlu1 %v998_v15  ;;  %996 = vadd.xlane.f32.xlu0 %v995_v56  ;;  %v1001_v12 = vadd.f32 %v3030_v25, %v3027_v55  ;;  %v3041_v7 = vsel %vm920_vm12, 0.0, %v2897_v29  ;;  %v888_v22 = vadd.s32 %v2902_v53, %v871_v26  ;;  %v870_v2 = vadd.s32 96, %v2672_v31 }
 0x136   : > { %v873_v15 = vadd.s32 120, %v2672_v31  ;;  %vm917_vm14 = vcmp.eq.s32.totalorder %v885_v18, %v2905_v16  ;;  %vm918_vm15 = vcmp.eq.s32.totalorder %v885_v18, %v2914_v21  ;;  %v872_v49 = vadd.s32 112, %v2672_v31 }
 0x137   : > { %v3050_v56 = vsel %vm917_vm14, 0.0, %v2888_v3  ;;  %v3053_v9 = vsel %vm918_vm15, 0.0, %v2891_v11  ;;  %vm923_vm0 = vcmp.eq.s32.totalorder %v888_v22, %v2905_v16  ;;  %vm924_vm1 = vcmp.eq.s32.totalorder %v888_v22, %v2914_v21 }
 0x138   : > { %v1010_v26 = vadd.f32 %v3041_v7, %v3037_v50  ;;  %v1007_v18 = vadd.f32 %v3053_v9, %v3050_v56  ;;  %v887_v31 = vadd.s32 %v2902_v53, %v870_v2  ;;  %v3063_v3 = vsel %vm923_vm0, 0.0, %v2822_v57 }
 0x139   : > { %1005 = vadd.xlane.f32.xlu1 %v1004_v33  ;;  %1002 = vadd.xlane.f32.xlu0 %v1001_v12  ;;  %v3066_v11 = vsel %vm924_vm1, 0.0, %v2825_v63  ;;  %v890_v29 = vadd.s32 %v2902_v53, %v873_v15  ;;  %v889_v22 = vadd.s32 %v2902_v53, %v872_v49 }
 0x13a   : > { %vm921_vm13 = vcmp.eq.s32.totalorder %v887_v31, %v2905_v16  ;;  %vm922_vm12 = vcmp.eq.s32.totalorder %v887_v31, %v2914_v21  ;;  %v1016_v2 = vadd.f32 %v3066_v11, %v3063_v3  ;;  %v1074_v31 = vsel %vm813_vm4, %v2923_v6, 0.0 }
 0x13b   : > { %v3073_v12 = vsel %vm921_vm13, 0.0, %v2816_v0  ;;  %v3076_v33 = vsel %vm922_vm12, 0.0, %v2819_v4  ;;  %vm927_vm14 = vcmp.eq.s32.totalorder %v890_v29, %v2905_v16  ;;  %vm928_vm15 = vcmp.eq.s32.totalorder %v890_v29, %v2914_v21 }
 0x13c   : > { %v1013_v53 = vadd.f32 %v3076_v33, %v3073_v12  ;;  %vm925_vm0 = vcmp.eq.s32.totalorder %v889_v22, %v2905_v16  ;;  %v3086_v15 = vsel %vm927_vm14, 0.0, %v2846_v1  ;;  %v3089_v49 = vsel %vm928_vm15, 0.0, %v2849_v28 }
 0x13d   : > { %1011 = vadd.xlane.f32.xlu1 %v1010_v26  ;;  %1008 = vadd.xlane.f32.xlu0 %v1007_v18  ;;  %vm926_vm1 = vcmp.eq.s32.totalorder %v889_v22, %v2914_v21  ;;  %v3093_v29 = vsel %vm925_vm0, 0.0, %v2840_v54  ;;  %v1022_v18 = vadd.f32 %v3089_v49, %v3086_v15  ;;  %v1075_v21 = vsel %vm814_vm5, %v2928_v52, 0.0 }
 0x13e   : > { %v3096_v26 = vsel %vm926_vm1, 0.0, %v2843_v30  ;;  %v1076_v22 = vsel %vm815_vm8, %v2954_v14, 0.0  ;;  %v1106_v30 = vadd.f32 %v1075_v21, %v1074_v31  ;;  %v1078_v6 = vsel %vm817_vm2, %v2931_v24, 0.0 }
 0x13f   : > { %v1019_v16 = vadd.f32 %v3096_v26, %v3093_v29  ;;  %v1079_v52 = vsel %vm818_vm3, %v2934_v51, 0.0  ;;  %v1080_v14 = vsel %vm819_vm6, %v2947_v58, 0.0  ;;  %v1084_v24 = vsel %vm823_vm10, %v2966_v13, 0.0 }
 0x140   : > { %v1085_v51 = vsel %vm824_vm11, %v2969_v8, 0.0  ;;  %vm3950_vm13 = vcmp.eq.s32.totalorder %v2722_v42, %v2681_v35  ;;  %vm3951_vm12 = vcmp.eq.s32.totalorder %v2722_v42, %v2685_v36  ;;  %vm3952_vm14 = vcmp.eq.s32.totalorder %v2732_v43, %v2681_v35 }
 0x141   : > { %1017 = vadd.xlane.f32.xlu1 %v1016_v2  ;;  %1014 = vadd.xlane.f32.xlu0 %v1013_v53  ;;  %v1077_v2 = vsel %vm816_vm9, %v2959_v61, 0.0  ;;  %v1081_v61 = vsel %vm820_vm7, %v2950_v34, 0.0  ;;  %v1082_v58 = vsel %vm3950_vm13, %v2976_v62, 0.0  ;;  %v1083_v34 = vsel %vm3951_vm12, %v2980_v23, 0.0 }
 0x142   : > { %v1109_v53 = vadd.f32 %v1077_v2, %v1076_v22  ;;  %v1118_v31 = vadd.f32 %v1083_v34, %v1082_v58  ;;  %v1088_v13 = vsel %vm3952_vm14, %v2991_v19, 0.0  ;;  %vm3953_vm15 = vcmp.eq.s32.totalorder %v2732_v43, %v2685_v36 }
 0x143   : > { %v1089_v8 = vsel %vm3953_vm15, %v2994_v60, 0.0  ;;  %vm3954_vm0 = vcmp.eq.s32.totalorder %v2734_v44, %v2681_v35  ;;  %vm3955_vm1 = vcmp.eq.s32.totalorder %v2734_v44, %v2685_v36  ;;  %vm3956_vm13 = vcmp.eq.s32.totalorder %v2744_v45, %v2681_v35 }
 0x144   : > { %v1086_v62 = vsel %vm3954_vm0, %v3008_v32, 0.0  ;;  %v1087_v23 = vsel %vm3955_vm1, %v3011_v17, 0.0  ;;  %v1127_v21 = vadd.f32 %v1089_v8, %v1088_v13  ;;  %v1092_v19 = vsel %vm3956_vm13, %v3015_v27, 0.0 }
 0x145   : > { %1023 = vadd.xlane.f32.xlu1 %v1022_v18  ;;  %1020 = vadd.xlane.f32.xlu0 %v1019_v16  ;;  %v1115_v18 = vadd.f32 %v1081_v61, %v1080_v14  ;;  %v1112_v16 = vadd.f32 %v1079_v52, %v1078_v6  ;;  %v1124_v22 = vadd.f32 %v1087_v23, %v1086_v62  ;;  %v964_v62 = vld [vmem:[#allocation2 + $0x18] sm:$0xff]  ;;  %v962_v23 = vld [vmem:[#allocation2 + $0x8] sm:$0xff] }
 0x146   : > { %vm3957_vm12 = vcmp.eq.s32.totalorder %v2744_v45, %v2685_v36  ;;  %vm3958_vm14 = vcmp.eq.s32.totalorder %v2746_v46, %v2681_v35  ;;  %vm3959_vm15 = vcmp.eq.s32.totalorder %v2746_v46, %v2685_v36  ;;  %vm3960_vm0 = vcmp.eq.s32.totalorder %v2756_v47, %v2681_v35 }
 0x147   : > { %v1093_v60 = vsel %vm3957_vm12, %v3020_v59, 0.0  ;;  %v1090_v32 = vsel %vm3958_vm14, %v3027_v55, 0.0  ;;  %v1091_v17 = vsel %vm3959_vm15, %v3030_v25, 0.0  ;;  %v1096_v27 = vsel %vm3960_vm0, %v3037_v50, 0.0  ;;  %v3964_v50 = vld [vmem:[#allocation28_spill] sm:$0xff] }
 0x148   : > { %v1133_v2 = vadd.f32 %v1093_v60, %v1092_v19  ;;  %vm3961_vm1 = vcmp.eq.s32.totalorder %v2756_v47, %v2685_v36  ;;  %vm3962_vm13 = vcmp.eq.s32.totalorder %v2758_v48, %v2681_v35  ;;  %vm3963_vm12 = vcmp.eq.s32.totalorder %v2758_v48, %v2685_v36  ;;  %v966_v19 = vld [vmem:[#allocation2 + $0x28] sm:$0xff]  ;;  %v965_v60 = vld [vmem:[#allocation2 + $0x20] sm:$0xff] }
 0x149   : > { %1110 = vadd.xlane.f32.xlu1 %v1109_v53  ;;  %1107 = vadd.xlane.f32.xlu0 %v1106_v30  ;;  %v1121_v30 = vadd.f32 %v1085_v51, %v1084_v24  ;;  %v1130_v53 = vadd.f32 %v1091_v17, %v1090_v32  ;;  %v1097_v59 = vsel %vm3961_vm1, %v3041_v7, 0.0  ;;  %v1094_v55 = vsel %vm3962_vm13, %v3050_v56, 0.0  ;;  %v3967_v56 = vld [vmem:[#allocation29_spill] sm:$0xff] }
 0x14a   : > { %v1095_v25 = vsel %vm3963_vm12, %v3053_v9, 0.0  ;;  %v1139_v6 = vadd.f32 %v1097_v59, %v1096_v27  ;;  %vm3965_vm14 = vcmp.eq.s32.totalorder %v3964_v50, %v2681_v35  ;;  %vm3966_vm15 = vcmp.eq.s32.totalorder %v3964_v50, %v2685_v36  ;;  %v968_v27 = vld [vmem:[#allocation2 + $0x38] sm:$0xff]  ;;  %v967_v59 = vld [vmem:[#allocation2 + $0x30] sm:$0xff]  ;;  %v970_v50 = vld [vmem:[#allocation2 + $0x48] sm:$0xff] }
 0x14b   : > { %v1136_v52 = vadd.f32 %v1095_v25, %v1094_v55  ;;  %v1100_v14 = vsel %vm3965_vm14, %v3063_v3, 0.0  ;;  %v1101_v7 = vsel %vm3966_vm15, %v3066_v11, 0.0  ;;  %vm3968_vm0 = vcmp.eq.s32.totalorder %v3967_v56, %v2681_v35  ;;  %v3970_v3 = vld [vmem:[#allocation30_spill] sm:$0xff] }
 0x14c   : > { %v1098_v61 = vsel %vm3968_vm0, %v3073_v12, 0.0  ;;  %vm3969_vm1 = vcmp.eq.s32.totalorder %v3967_v56, %v2685_v36  ;;  %vm3971_vm13 = vcmp.eq.s32.totalorder %v3970_v3, %v2681_v35  ;;  %vm3972_vm12 = vcmp.eq.s32.totalorder %v3970_v3, %v2685_v36  ;;  %v3973_v12 = vld [vmem:[#allocation31_spill] sm:$0xff] }
 0x14d   : > { %1116 = vadd.xlane.f32.xlu1 %v1115_v18  ;;  %1113 = vadd.xlane.f32.xlu0 %v1112_v16  ;;  %v1099_v9 = vsel %vm3969_vm1, %v3076_v33, 0.0  ;;  %v1145_v18 = vadd.f32 %v1101_v7, %v1100_v14  ;;  %v1104_v24 = vsel %vm3971_vm13, %v3086_v15, 0.0  ;;  %v1105_v11 = vsel %vm3972_vm12, %v3089_v49, 0.0  ;;  %v961_v15 = vld [vmem:[#allocation2] sm:$0xff] }
 0x14e   : > { %v1142_v16 = vadd.f32 %v1099_v9, %v1098_v61  ;;  %vm3974_vm14 = vcmp.eq.s32.totalorder %v3973_v12, %v2681_v35  ;;  %vm3975_vm15 = vcmp.eq.s32.totalorder %v3973_v12, %v2685_v36  ;;  %v1151_v58 = vadd.f32 %v1105_v11, %v1104_v24  ;;  %v969_v14 = vld [vmem:[#allocation2 + $0x40] sm:$0xff] }
 0x14f   : > { %v1102_v51 = vsel %vm3974_vm14, %v3093_v29, 0.0  ;;  %v1103_v33 = vsel %vm3975_vm15, %v3096_v26, 0.0  ;;  %vm3976_vm0 = vcmask 7168  }
 0x150   : > { %v1148_v34 = vadd.f32 %v1103_v33, %v1102_v51  ;;  %vm3977_vm1 = vmmov %vm3976_vm0  ;;  %v974_v51 = vld [vmem:[#allocation2 + $0x68] sm:$0xff]  ;;  %v973_v33 = vld [vmem:[#allocation2 + $0x60] sm:$0xff] }
 0x151   : > { %1122 = vadd.xlane.f32.xlu1 %v1121_v30  ;;  %1119 = vadd.xlane.f32.xlu0 %v1118_v31  ;;  %v963_v30 = vld [vmem:[#allocation2 + $0x10] sm:$0xff]  ;;  %vm3978_vm13 = vmmov %vm3976_vm0 }
 0x152   : > { %vm3979_vm12 = vmmov %vm3976_vm0 }
 0x153   : > { %vm3980_vm14 = vmmov %vm3976_vm0 }
 0x154   : > { %vm3981_vm15 = vmmov %vm3976_vm0 }
 0x155   : > { %1128 = vadd.xlane.f32.xlu1 %v1127_v21  ;;  %1125 = vadd.xlane.f32.xlu0 %v1124_v22 }
 0x159   : > { %1134 = vadd.xlane.f32.xlu1 %v1133_v2  ;;  %1131 = vadd.xlane.f32.xlu0 %v1130_v53 }
 0x15d   : > { %1140 = vadd.xlane.f32.xlu1 %v1139_v6  ;;  %1137 = vadd.xlane.f32.xlu0 %v1136_v52 }
 0x161   : > { %1146 = vadd.xlane.f32.xlu1 %v1145_v18  ;;  %1143 = vadd.xlane.f32.xlu0 %v1142_v16  ;;  %v972_v18 = vld [vmem:[#allocation2 + $0x58] sm:$0xff]  ;;  %v971_v16 = vld [vmem:[#allocation2 + $0x50] sm:$0xff] }
 0x165   : > { %1152 = vadd.xlane.f32.xlu1 %v1151_v58  ;;  %1149 = vadd.xlane.f32.xlu0 %v1148_v34 }
 0x1b6   : > { %v979_v31 = vpop.xlane.xlu0 %978  ;;  %v985_v49 = vpop.xlane.xlu1 %984 }
 0x1b7   : > { %v1025_v13 = vadd.f32 %v979_v31, %v961_v15  ;;  %v1027_v8 = vadd.f32 %v985_v49, %v963_v30  ;;  %v976_v31 = vld [vmem:[#allocation2 + $0x78] sm:$0xff]  ;;  %v975_v49 = vld [vmem:[#allocation2 + $0x70] sm:$0xff] }
 0x1b9   : > { %1042 = vst.msk [vmem:[#allocation2] sm:$0xff] %vm3976_vm0, %v1025_v13 }
 0x1ba   : > { %1044 = vst.msk [vmem:[#allocation2 + $0x10] sm:$0xff] %vm3977_vm1, %v1027_v8  ;;  %v988_v29 = vpop.xlane.xlu1 %987  ;;  %v982_v26 = vpop.xlane.xlu0 %981  ;;  %vm3982_vm1 = vmmov %vm3976_vm0 }
 0x1bb   : > { %v1028_v21 = vadd.f32 %v988_v29, %v964_v62  ;;  %v1026_v22 = vadd.f32 %v982_v26, %v962_v23  ;;  %v1059_v29 = vld [vmem:[#allocation3 + $0x8] sm:$0xff]  ;;  %v1058_v26 = vld [vmem:[#allocation3] sm:$0xff] }
 0x1bd   : > { %1045 = vst.msk [vmem:[#allocation2 + $0x18] sm:$0xff] %vm3978_vm13, %v1028_v21  ;;  %vm3983_vm13 = vmmov %vm3976_vm0 }
 0x1be   : > { %1043 = vst.msk [vmem:[#allocation2 + $0x8] sm:$0xff] %vm3979_vm12, %v1026_v22  ;;  %v994_v32 = vpop.xlane.xlu1 %993  ;;  %v991_v17 = vpop.xlane.xlu0 %990  ;;  %vm3984_vm12 = vmmov %vm3976_vm0 }
 0x1bf   : > { %v1030_v2 = vadd.f32 %v994_v32, %v966_v19  ;;  %v1029_v53 = vadd.f32 %v991_v17, %v965_v60  ;;  %v1061_v32 = vld [vmem:[#allocation3 + $0x18] sm:$0xff]  ;;  %v1060_v17 = vld [vmem:[#allocation3 + $0x10] sm:$0xff] }
 0x1c1   : > { %1047 = vst.msk [vmem:[#allocation2 + $0x28] sm:$0xff] %vm3980_vm14, %v1030_v2  ;;  %vm3985_vm14 = vmmov %vm3976_vm0 }
 0x1c2   : > { %1046 = vst.msk [vmem:[#allocation2 + $0x20] sm:$0xff] %vm3981_vm15, %v1029_v53  ;;  %v1000_v55 = vpop.xlane.xlu1 %999  ;;  %v997_v25 = vpop.xlane.xlu0 %996  ;;  %vm3986_vm15 = vmmov %vm3976_vm0 }
 0x1c3   : > { %v1032_v6 = vadd.f32 %v1000_v55, %v968_v27  ;;  %v1031_v52 = vadd.f32 %v997_v25, %v967_v59  ;;  %v1063_v55 = vld [vmem:[#allocation3 + $0x28] sm:$0xff]  ;;  %v1062_v25 = vld [vmem:[#allocation3 + $0x20] sm:$0xff] }
 0x1c5   : > { %1049 = vst.msk [vmem:[#allocation2 + $0x38] sm:$0xff] %vm3976_vm0, %v1032_v6 }
 0x1c6   : > { %1048 = vst.msk [vmem:[#allocation2 + $0x30] sm:$0xff] %vm3982_vm1, %v1031_v52  ;;  %v1006_v7 = vpop.xlane.xlu1 %1005  ;;  %v1003_v56 = vpop.xlane.xlu0 %1002  ;;  %vm3987_vm1 = vmmov %vm3976_vm0 }
 0x1c7   : > { %v1034_v61 = vadd.f32 %v1006_v7, %v970_v50  ;;  %v1033_v9 = vadd.f32 %v1003_v56, %v969_v14  ;;  %v1065_v7 = vld [vmem:[#allocation3 + $0x38] sm:$0xff]  ;;  %v1064_v56 = vld [vmem:[#allocation3 + $0x30] sm:$0xff] }
 0x1c9   : > { %1051 = vst.msk [vmem:[#allocation2 + $0x48] sm:$0xff] %vm3983_vm13, %v1034_v61  ;;  %vm3988_vm13 = vmmov %vm3976_vm0 }
 0x1ca   : > { %1050 = vst.msk [vmem:[#allocation2 + $0x40] sm:$0xff] %vm3984_vm12, %v1033_v9  ;;  %v1012_v3 = vpop.xlane.xlu1 %1011  ;;  %v1009_v24 = vpop.xlane.xlu0 %1008  ;;  %vm3989_vm12 = vmmov %vm3976_vm0 }
 0x1cb   : > { %v1036_v11 = vadd.f32 %v1012_v3, %v972_v18  ;;  %v1035_v12 = vadd.f32 %v1009_v24, %v971_v16  ;;  %v1067_v3 = vld [vmem:[#allocation3 + $0x48] sm:$0xff]  ;;  %v1066_v24 = vld [vmem:[#allocation3 + $0x40] sm:$0xff] }
 0x1cd   : > { %1053 = vst.msk [vmem:[#allocation2 + $0x58] sm:$0xff] %vm3985_vm14, %v1036_v11  ;;  %vm3990_vm14 = vmmov %vm3976_vm0 }
 0x1ce   : > { %1052 = vst.msk [vmem:[#allocation2 + $0x50] sm:$0xff] %vm3986_vm15, %v1035_v12  ;;  %v1018_v58 = vpop.xlane.xlu1 %1017  ;;  %v1015_v34 = vpop.xlane.xlu0 %1014  ;;  %vm3991_vm15 = vmmov %vm3976_vm0 }
 0x1cf   : > { %v1038_v15 = vadd.f32 %v1018_v58, %v974_v51  ;;  %v1037_v30 = vadd.f32 %v1015_v34, %v973_v33  ;;  %v1069_v58 = vld [vmem:[#allocation3 + $0x58] sm:$0xff]  ;;  %v1068_v34 = vld [vmem:[#allocation3 + $0x50] sm:$0xff] }
 0x1d1   : > { %1055 = vst.msk [vmem:[#allocation2 + $0x68] sm:$0xff] %vm3976_vm0, %v1038_v15 }
 0x1d2   : > { %1054 = vst.msk [vmem:[#allocation2 + $0x60] sm:$0xff] %vm3987_vm1, %v1037_v30  ;;  %v1024_v13 = vpop.xlane.xlu1 %1023  ;;  %v1021_v8 = vpop.xlane.xlu0 %1020  ;;  %vm3992_vm1 = vmmov %vm3976_vm0 }
 0x1d3   : > { %v1040_v62 = vadd.f32 %v1024_v13, %v976_v31  ;;  %v1039_v23 = vadd.f32 %v1021_v8, %v975_v49  ;;  %v1071_v13 = vld [vmem:[#allocation3 + $0x68] sm:$0xff]  ;;  %v1070_v8 = vld [vmem:[#allocation3 + $0x60] sm:$0xff] }
 0x1d5   : > { %1057 = vst.msk [vmem:[#allocation2 + $0x78] sm:$0xff] %vm3988_vm13, %v1040_v62  ;;  %vm3993_vm13 = vmmov %vm3976_vm0 }
 0x1d6   : > { %1056 = vst.msk [vmem:[#allocation2 + $0x70] sm:$0xff] %vm3989_vm12, %v1039_v23  ;;  %v1111_v21 = vpop.xlane.xlu1 %1110  ;;  %v1108_v22 = vpop.xlane.xlu0 %1107  ;;  %vm3994_vm12 = vmmov %vm3976_vm0 }
 0x1d7   : > { %v1155_v19 = vadd.f32 %v1111_v21, %v1059_v29  ;;  %v1154_v60 = vadd.f32 %v1108_v22, %v1058_v26  ;;  %v1073_v21 = vld [vmem:[#allocation3 + $0x78] sm:$0xff]  ;;  %v1072_v22 = vld [vmem:[#allocation3 + $0x70] sm:$0xff] }
 0x1d9   : > { %1171 = vst.msk [vmem:[#allocation3 + $0x8] sm:$0xff] %vm3990_vm14, %v1155_v19  ;;  %vm3995_vm14 = vmmov %vm3976_vm0 }
 0x1da   : > { %1170 = vst.msk [vmem:[#allocation3] sm:$0xff] %vm3991_vm15, %v1154_v60  ;;  %v1117_v2 = vpop.xlane.xlu1 %1116  ;;  %v1114_v53 = vpop.xlane.xlu0 %1113  ;;  %vm3996_vm15 = vmmov %vm3976_vm0 }
 0x1db   : > { %v1157_v27 = vadd.f32 %v1117_v2, %v1061_v32  ;;  %v1156_v59 = vadd.f32 %v1114_v53, %v1060_v17 }
 0x1dd   : > { %1173 = vst.msk [vmem:[#allocation3 + $0x18] sm:$0xff] %vm3976_vm0, %v1157_v27 }
 0x1de   : > { %1172 = vst.msk [vmem:[#allocation3 + $0x10] sm:$0xff] %vm3992_vm1, %v1156_v59  ;;  %v1123_v6 = vpop.xlane.xlu1 %1122  ;;  %v1120_v52 = vpop.xlane.xlu0 %1119  ;;  %vm3997_vm1 = vmmov %vm3976_vm0 }
 0x1df   : > { %v1159_v50 = vadd.f32 %v1123_v6, %v1063_v55  ;;  %v1158_v14 = vadd.f32 %v1120_v52, %v1062_v25 }
 0x1e1   : > { %1175 = vst.msk [vmem:[#allocation3 + $0x28] sm:$0xff] %vm3993_vm13, %v1159_v50  ;;  %vm3998_vm13 = vmmov %vm3976_vm0 }
 0x1e2   : > { %1174 = vst.msk [vmem:[#allocation3 + $0x20] sm:$0xff] %vm3994_vm12, %v1158_v14  ;;  %v1129_v61 = vpop.xlane.xlu1 %1128  ;;  %v1126_v9 = vpop.xlane.xlu0 %1125  ;;  %vm3999_vm12 = vmmov %vm3976_vm0 }
 0x1e3   : > { %v1161_v18 = vadd.f32 %v1129_v61, %v1065_v7  ;;  %v1160_v16 = vadd.f32 %v1126_v9, %v1064_v56 }
 0x1e5   : > { %1177 = vst.msk [vmem:[#allocation3 + $0x38] sm:$0xff] %vm3995_vm14, %v1161_v18  ;;  %vm4000_vm14 = vmmov %vm3976_vm0 }
 0x1e6   : > { %1176 = vst.msk [vmem:[#allocation3 + $0x30] sm:$0xff] %vm3996_vm15, %v1160_v16  ;;  %v1135_v11 = vpop.xlane.xlu1 %1134  ;;  %v1132_v12 = vpop.xlane.xlu0 %1131  ;;  %vm4001_vm15 = vmmov %vm3976_vm0 }
 0x1e7   : > { %v1163_v51 = vadd.f32 %v1135_v11, %v1067_v3  ;;  %v1162_v33 = vadd.f32 %v1132_v12, %v1066_v24 }
 0x1e9   : > { %1179 = vst.msk [vmem:[#allocation3 + $0x48] sm:$0xff] %vm3976_vm0, %v1163_v51 }
 0x1ea   : > { %1178 = vst.msk [vmem:[#allocation3 + $0x40] sm:$0xff] %vm3997_vm1, %v1162_v33  ;;  %v1141_v15 = vpop.xlane.xlu1 %1140  ;;  %v1138_v30 = vpop.xlane.xlu0 %1137  ;;  %vm4002_vm1 = vmmov %vm3976_vm0 }
 0x1eb   : > { %v1165_v31 = vadd.f32 %v1141_v15, %v1069_v58  ;;  %v1164_v49 = vadd.f32 %v1138_v30, %v1068_v34 }
 0x1ed   : > { %1181 = vst.msk [vmem:[#allocation3 + $0x58] sm:$0xff] %vm3998_vm13, %v1165_v31 }
 0x1ee   : > { %1180 = vst.msk [vmem:[#allocation3 + $0x50] sm:$0xff] %vm3999_vm12, %v1164_v49  ;;  %v1147_v62 = vpop.xlane.xlu1 %1146  ;;  %v1144_v23 = vpop.xlane.xlu0 %1143 }
 0x1ef   : > { %v1167_v29 = vadd.f32 %v1147_v62, %v1071_v13  ;;  %v1166_v26 = vadd.f32 %v1144_v23, %v1070_v8 }
 0x1f1   : > { %1183 = vst.msk [vmem:[#allocation3 + $0x68] sm:$0xff] %vm4000_vm14, %v1167_v29 }
 0x1f2   : > { %1182 = vst.msk [vmem:[#allocation3 + $0x60] sm:$0xff] %vm4001_vm15, %v1166_v26  ;;  %v1153_v19 = vpop.xlane.xlu1 %1152  ;;  %v1150_v60 = vpop.xlane.xlu0 %1149 }
 0x1f3   : > { %v1169_v32 = vadd.f32 %v1153_v19, %v1073_v21  ;;  %v1168_v17 = vadd.f32 %v1150_v60, %v1072_v22 }
 0x1f5   : > { %1185 = vst.msk [vmem:[#allocation3 + $0x78] sm:$0xff] %vm3976_vm0, %v1169_v32 }
 0x1f6   : > { %1184 = vst.msk [vmem:[#allocation3 + $0x70] sm:$0xff] %vm4002_vm1, %v1168_v17 }
 0x1f7 PF: > { %1188 = sbr.rel (!%p2716_p7) target bundleno = 712 (0x2c8), region = 60  ;;  %v4003_v2 = vld [vmem:[#allocation36_spill] sm:$0xff] (%p2716_p7)  ;;  %v4004_v53 = vld [vmem:[#allocation37_spill] sm:$0xff] (%p2716_p7)  ;;  %v4007_v6 = vld [vmem:[#allocation38_spill] sm:$0xff] (%p2716_p7)  ;;  %v1244_v26 = vadd.f32 (%p2716_p7), %v2825_v63, %v2822_v57  ;;  %v1241_v21 = vadd.f32 (%p2716_p7), %v2819_v4, %v2816_v0  ;;  %v1250_v22 = vadd.f32 (%p2716_p7), %v2849_v28, %v2846_v1  ;;  %vm4035_vm13 = vcmp.eq.s32.totalorder (%p2716_p7), %v2756_v47, %v2681_v35 }
 0x1f8   : > { %v1211_v27 = vadd.f32 (%p2716_p7), %v4004_v53, %v4003_v2  ;;  %v4005_v59 = vld [vmem:[#allocation32_spill] sm:$0xff] (%p2716_p7)  ;;  %v4006_v55 = vld [vmem:[#allocation33_spill] sm:$0xff] (%p2716_p7)  ;;  %v4008_v52 = vld [vmem:[#allocation39_spill] sm:$0xff] (%p2716_p7)  ;;  %vm4036_vm12 = vcmp.eq.s32.totalorder (%p2716_p7), %v2756_v47, %v2685_v36  ;;  %vm4037_vm14 = vcmp.eq.s32.totalorder (%p2716_p7), %v2758_v48, %v2681_v35  ;;  %vm4038_vm15 = vcmp.eq.s32.totalorder (%p2716_p7), %v2758_v48, %v2685_v36 }
 0x1f9   : > { %v1205_v25 = vadd.f32 (%p2716_p7), %v4006_v55, %v4005_v59  ;;  %v1214_v50 = vadd.f32 (%p2716_p7), %v4008_v52, %v4007_v6  ;;  %v4009_v14 = vld [vmem:[#allocation34_spill] sm:$0xff] (%p2716_p7)  ;;  %v4010_v7 = vld [vmem:[#allocation35_spill] sm:$0xff] (%p2716_p7)  ;;  %v4012_v9 = vld [vmem:[#allocation44_spill] sm:$0xff] (%p2716_p7) }
 0x1fa   : > { %1212 = vadd.xlane.f32.xlu1 (%p2716_p7), %v1211_v27  ;;  %v1208_v56 = vadd.f32 (%p2716_p7), %v4010_v7, %v4009_v14  ;;  %v4011_v61 = vld [vmem:[#allocation43_spill] sm:$0xff] (%p2716_p7)  ;;  %v4013_v16 = vld [vmem:[#allocation41_spill] sm:$0xff] (%p2716_p7)  ;;  %v4014_v3 = vld [vmem:[#allocation42_spill] sm:$0xff] (%p2716_p7)  ;;  %v1304_v32 = vsel (%p2716_p7), %vm815_vm8, %v4009_v14, 0.0  ;;  %v1305_v17 = vsel (%p2716_p7), %vm816_vm9, %v4010_v7, 0.0  ;;  %v1302_v27 = vsel (%p2716_p7), %vm813_vm4, %v4005_v59, 0.0 }
 0x1fb   : > { %1206 = vadd.xlane.f32.xlu0 (%p2716_p7), %v1205_v25  ;;  %v1220_v18 = vadd.f32 (%p2716_p7), %v4012_v9, %v4011_v61  ;;  %v1217_v24 = vadd.f32 (%p2716_p7), %v4014_v3, %v4013_v16  ;;  %v4015_v11 = vld [vmem:[#allocation46_spill] sm:$0xff] (%p2716_p7)  ;;  %v4016_v51 = vld [vmem:[#allocation45_spill] sm:$0xff] (%p2716_p7)  ;;  %v4019_v30 = vld [vmem:[#allocation47_spill] sm:$0xff] (%p2716_p7)  ;;  %v1303_v25 = vsel (%p2716_p7), %vm814_vm5, %v4006_v55, 0.0  ;;  %v1308_v14 = vsel (%p2716_p7), %vm819_vm6, %v4007_v6, 0.0 }
 0x1fc   : > { %v1226_v12 = vadd.f32 (%p2716_p7), %v4015_v11, %v2870_v20  ;;  %v1223_v33 = vadd.f32 (%p2716_p7), %v4016_v51, %v2864_v10  ;;  %v4017_v58 = vld [vmem:[#allocation49_spill] sm:$0xff] (%p2716_p7)  ;;  %v4018_v34 = vld [vmem:[#allocation50_spill] sm:$0xff] (%p2716_p7)  ;;  %v4020_v31 = vld [vmem:[#allocation48_spill] sm:$0xff] (%p2716_p7)  ;;  %v1309_v7 = vsel (%p2716_p7), %vm820_vm7, %v4008_v52, 0.0  ;;  %v1306_v59 = vsel (%p2716_p7), %vm817_vm2, %v4003_v2, 0.0 }
 0x1fd   : > { %v1232_v15 = vadd.f32 (%p2716_p7), %v4018_v34, %v4017_v58  ;;  %v1229_v49 = vadd.f32 (%p2716_p7), %v4020_v31, %v4019_v30  ;;  %v4021_v13 = vld [vmem:[#allocation53_spill] sm:$0xff] (%p2716_p7)  ;;  %v4022_v62 = vld [vmem:[#allocation51_spill] sm:$0xff] (%p2716_p7)  ;;  %v4023_v23 = vld [vmem:[#allocation52_spill] sm:$0xff] (%p2716_p7)  ;;  %v1307_v55 = vsel (%p2716_p7), %vm818_vm3, %v4004_v53, 0.0  ;;  %v1312_v6 = vsel (%p2716_p7), %vm823_vm10, %v4011_v61, 0.0 }
 0x1fe   : > { %1215 = vadd.xlane.f32.xlu1 %v1214_v50  ;;  %v1238_v8 = vadd.f32 %v4021_v13, %v2894_v5  ;;  %v1235_v29 = vadd.f32 %v4023_v23, %v4022_v62  ;;  %v4024_v19 = vld [vmem:[#allocation40_spill] sm:$0xff]  ;;  %v1337_v50 = vadd.f32 %v1305_v17, %v1304_v32  ;;  %v1313_v52 = vsel %vm824_vm11, %v4012_v9, 0.0 }
 0x1ff   : > { %1209 = vadd.xlane.f32.xlu0 %v1208_v56  ;;  %v1247_v60 = vadd.f32 %v4024_v19, %v2840_v54  ;;  %v1334_v56 = vadd.f32 %v1303_v25, %v1302_v27  ;;  %vm4025_vm2 = vcmp.eq.s32.totalorder %v2722_v42, %v2681_v35  ;;  %vm4026_vm3 = vcmp.eq.s32.totalorder %v2722_v42, %v2685_v36 }
 0x200   : > { %v1310_v2 = vsel %vm4025_vm2, %v4013_v16, 0.0  ;;  %v1311_v53 = vsel %vm4026_vm3, %v4014_v3, 0.0  ;;  %vm4027_vm4 = vcmp.eq.s32.totalorder %v2732_v43, %v2681_v35  ;;  %vm4028_vm5 = vcmp.eq.s32.totalorder %v2732_v43, %v2685_v36 }
 0x201   : > { %v1316_v61 = vsel %vm4027_vm4, %v2870_v20, 0.0  ;;  %v1317_v9 = vsel %vm4028_vm5, %v4015_v11, 0.0  ;;  %vm4029_vm6 = vcmp.eq.s32.totalorder %v2734_v44, %v2681_v35  ;;  %vm4030_vm7 = vcmp.eq.s32.totalorder %v2734_v44, %v2685_v36 }
 0x202   : > { %1221 = vadd.xlane.f32.xlu1 %v1220_v18  ;;  %v1343_v18 = vadd.f32 %v1309_v7, %v1308_v14  ;;  %v1314_v16 = vsel %vm4029_vm6, %v2864_v10, 0.0  ;;  %v1315_v3 = vsel %vm4030_vm7, %v4016_v51, 0.0  ;;  %vm4031_vm8 = vcmp.eq.s32.totalorder %v2744_v45, %v2681_v35  ;;  %v1189_v14 = vld [vmem:[#allocation2] sm:$0xff] }
 0x203   : > { %1218 = vadd.xlane.f32.xlu0 %v1217_v24  ;;  %v1340_v24 = vadd.f32 %v1307_v55, %v1306_v59  ;;  %v1320_v20 = vsel %vm4031_vm8, %v4017_v58, 0.0  ;;  %vm4032_vm9 = vcmp.eq.s32.totalorder %v2744_v45, %v2685_v36  ;;  %vm4033_vm10 = vcmp.eq.s32.totalorder %v2746_v46, %v2681_v35 }
 0x204   : > { %v1321_v11 = vsel %vm4032_vm9, %v4018_v34, 0.0  ;;  %v1318_v10 = vsel %vm4033_vm10, %v4019_v30, 0.0  ;;  %vm4034_vm11 = vcmp.eq.s32.totalorder %v2746_v46, %v2685_v36  ;;  %v1324_v58 = vsel %vm4035_vm13, %v2894_v5, 0.0  ;;  %v4039_v5 = vld [vmem:[#allocation28_spill] sm:$0xff] }
 0x205   : > { %v1319_v51 = vsel %vm4034_vm11, %v4020_v31, 0.0  ;;  %v1325_v34 = vsel %vm4036_vm12, %v4021_v13, 0.0  ;;  %v1322_v30 = vsel %vm4037_vm14, %v4022_v62, 0.0  ;;  %v1323_v31 = vsel %vm4038_vm15, %v4023_v23, 0.0  ;;  %v4042_v62 = vld [vmem:[#allocation29_spill] sm:$0xff] }
 0x206   : > { %1227 = vadd.xlane.f32.xlu1 %v1226_v12  ;;  %v1349_v12 = vadd.f32 %v1313_v52, %v1312_v6  ;;  %vm4040_vm0 = vcmp.eq.s32.totalorder %v4039_v5, %v2681_v35  ;;  %vm4041_vm1 = vcmp.eq.s32.totalorder %v4039_v5, %v2685_v36  ;;  %vm4043_vm2 = vcmp.eq.s32.totalorder %v4042_v62, %v2681_v35  ;;  %v1194_v6 = vld [vmem:[#allocation2 + $0x28] sm:$0xff]  ;;  %v1193_v52 = vld [vmem:[#allocation2 + $0x20] sm:$0xff] }
 0x207   : > { %1224 = vadd.xlane.f32.xlu0 %v1223_v33  ;;  %v1346_v33 = vadd.f32 %v1311_v53, %v1310_v2  ;;  %v1329_v13 = vsel %vm4041_vm1, %v2825_v63, 0.0  ;;  %vm4044_vm3 = vcmp.eq.s32.totalorder %v4042_v62, %v2685_v36  ;;  %vm4051_vm8 = vcmask 7168   ;;  %v1202_v5 = vld [vmem:[#allocation2 + $0x68] sm:$0xff] }
 0x208   : > { %v1327_v23 = vsel %vm4044_vm3, %v2819_v4, 0.0  ;;  %vm4052_vm9 = vmmov %vm4051_vm8 }
 0x209   : > { %vm4053_vm10 = vmmov %vm4051_vm8 }
 0x20a   : > { %1233 = vadd.xlane.f32.xlu1 %v1232_v15  ;;  %v1355_v15 = vadd.f32 %v1317_v9, %v1316_v61  ;;  %vm4054_vm11 = vmmov %vm4051_vm8  ;;  %v1196_v61 = vld [vmem:[#allocation2 + $0x38] sm:$0xff]  ;;  %v1195_v9 = vld [vmem:[#allocation2 + $0x30] sm:$0xff] }
 0x20b   : > { %1230 = vadd.xlane.f32.xlu0 %v1229_v49  ;;  %v1352_v49 = vadd.f32 %v1315_v3, %v1314_v16  ;;  %vm4055_vm13 = vmmov %vm4051_vm8 }
 0x20c   : > { %vm4056_vm12 = vmmov %vm4051_vm8 }
 0x20d   : > { %vm4057_vm14 = vmmov %vm4051_vm8 }
 0x20e   : > { %1239 = vadd.xlane.f32.xlu1 %v1238_v8  ;;  %v1361_v8 = vadd.f32 %v1321_v11, %v1320_v20  ;;  %v1198_v20 = vld [vmem:[#allocation2 + $0x48] sm:$0xff]  ;;  %v1197_v11 = vld [vmem:[#allocation2 + $0x40] sm:$0xff]  ;;  %vm4058_vm15 = vmmov %vm4051_vm8 }
 0x20f   : > { %1236 = vadd.xlane.f32.xlu0 %v1235_v29  ;;  %v1358_v29 = vadd.f32 %v1319_v51, %v1318_v10 }
 0x212   : > { %1245 = vadd.xlane.f32.xlu1 %v1244_v26  ;;  %v1367_v26 = vadd.f32 %v1325_v34, %v1324_v58  ;;  %v1200_v58 = vld [vmem:[#allocation2 + $0x58] sm:$0xff]  ;;  %v1199_v34 = vld [vmem:[#allocation2 + $0x50] sm:$0xff] }
 0x213   : > { %1242 = vadd.xlane.f32.xlu0 %v1241_v21  ;;  %v1364_v21 = vadd.f32 %v1323_v31, %v1322_v30 }
 0x216   : > { %1251 = vadd.xlane.f32.xlu1 %v1250_v22  ;;  %v1328_v22 = vsel %vm4040_vm0, %v2822_v57, 0.0  ;;  %v4045_v57 = vld [vmem:[#allocation30_spill] sm:$0xff]  ;;  %vm4059_vm0 = vmmov %vm4051_vm8 }
 0x217   : > { %1248 = vadd.xlane.f32.xlu0 %v1247_v60  ;;  %v1326_v60 = vsel %vm4043_vm2, %v2816_v0, 0.0  ;;  %v1373_v32 = vadd.f32 %v1329_v13, %v1328_v22  ;;  %vm4046_vm4 = vcmp.eq.s32.totalorder %v4045_v57, %v2681_v35  ;;  %vm4047_vm5 = vcmp.eq.s32.totalorder %v4045_v57, %v2685_v36  ;;  %v4048_v0 = vld [vmem:[#allocation31_spill] sm:$0xff]  ;;  %vm4060_vm1 = vmmov %vm4059_vm0  ;;  %v1201_v22 = vld [vmem:[#allocation2 + $0x60] sm:$0xff] }
 0x218   : > { %v1370_v17 = vadd.f32 %v1327_v23, %v1326_v60  ;;  %v1332_v27 = vsel %vm4046_vm4, %v2846_v1, 0.0  ;;  %v1333_v63 = vsel %vm4047_vm5, %v2849_v28, 0.0  ;;  %vm4049_vm6 = vcmp.eq.s32.totalorder %v4048_v0, %v2681_v35  ;;  %v1191_v1 = vld [vmem:[#allocation2 + $0x10] sm:$0xff]  ;;  %v1190_v35 = vld [vmem:[#allocation2 + $0x8] sm:$0xff]  ;;  %vm4061_vm2 = vmmov %vm4059_vm0 }
 0x219   : > { %v1330_v25 = vsel %vm4049_vm6, %v2840_v54, 0.0  ;;  %vm4050_vm7 = vcmp.eq.s32.totalorder %v4048_v0, %v2685_v36  ;;  %vm4062_vm3 = vmmov %vm4059_vm0 }
 0x21a   : > { %1338 = vadd.xlane.f32.xlu1 %v1337_v50  ;;  %v1331_v4 = vsel %vm4050_vm7, %v4024_v19, 0.0  ;;  %v1379_v50 = vadd.f32 %v1333_v63, %v1332_v27  ;;  %vm4063_vm4 = vmmov %vm4059_vm0 }
 0x21b   : > { %1335 = vadd.xlane.f32.xlu0 %v1334_v56  ;;  %v1376_v56 = vadd.f32 %v1331_v4, %v1330_v25  ;;  %vm4064_vm5 = vmmov %vm4059_vm0  ;;  %v1287_v25 = vld [vmem:[#allocation3 + $0x8] sm:$0xff]  ;;  %v1286_v4 = vld [vmem:[#allocation3] sm:$0xff] }
 0x21c   : > { %vm4065_vm6 = vmmov %vm4059_vm0 }
 0x21d   : > { %vm4066_vm7 = vmmov %vm4059_vm0 }
 0x21e   : > { %1344 = vadd.xlane.f32.xlu1 %v1343_v18  ;;  %v1192_v18 = vld [vmem:[#allocation2 + $0x18] sm:$0xff] }
 0x21f   : > { %1341 = vadd.xlane.f32.xlu0 %v1340_v24 }
 0x222   : > { %1350 = vadd.xlane.f32.xlu1 %v1349_v12 }
 0x223   : > { %1347 = vadd.xlane.f32.xlu0 %v1346_v33 }
 0x226   : > { %1356 = vadd.xlane.f32.xlu1 %v1355_v15 }
 0x227   : > { %1353 = vadd.xlane.f32.xlu0 %v1352_v49 }
 0x22a   : > { %1362 = vadd.xlane.f32.xlu1 %v1361_v8 }
 0x22b   : > { %1359 = vadd.xlane.f32.xlu0 %v1358_v29 }
 0x22e   : > { %1368 = vadd.xlane.f32.xlu1 %v1367_v26 }
 0x22f   : > { %1365 = vadd.xlane.f32.xlu0 %v1364_v21 }
 0x232   : > { %1374 = vadd.xlane.f32.xlu1 %v1373_v32  ;;  %v1204_v32 = vld [vmem:[#allocation2 + $0x78] sm:$0xff] }
 0x233   : > { %1371 = vadd.xlane.f32.xlu0 %v1370_v17  ;;  %v1203_v17 = vld [vmem:[#allocation2 + $0x70] sm:$0xff] }
 0x236   : > { %1380 = vadd.xlane.f32.xlu1 %v1379_v50 }
 0x237   : > { %1377 = vadd.xlane.f32.xlu0 %v1376_v56 }
 0x287   : > { %v1213_v7 = vpop.xlane.xlu1 %1212 }
 0x288   : > { %v1207_v28 = vpop.xlane.xlu0 %1206  ;;  %v1255_v59 = vadd.f32 %v1213_v7, %v1191_v1  ;;  %v1289_v7 = vld [vmem:[#allocation3 + $0x18] sm:$0xff] }
 0x289   : > { %v1253_v55 = vadd.f32 %v1207_v28, %v1189_v14  ;;  %v1288_v28 = vld [vmem:[#allocation3 + $0x10] sm:$0xff] }
 0x28a   : > { %1272 = vst.msk [vmem:[#allocation2 + $0x10] sm:$0xff] %vm4051_vm8, %v1255_v59  ;;  %vm4067_vm8 = vmmov %vm4059_vm0 }
 0x28b   : > { %1270 = vst.msk [vmem:[#allocation2] sm:$0xff] %vm4052_vm9, %v1253_v55  ;;  %v1216_v36 = vpop.xlane.xlu1 %1215  ;;  %vm4068_vm9 = vmmov %vm4059_vm0 }
 0x28c   : > { %v1210_v54 = vpop.xlane.xlu0 %1209  ;;  %v1256_v19 = vadd.f32 %v1216_v36, %v1192_v18  ;;  %v1291_v36 = vld [vmem:[#allocation3 + $0x28] sm:$0xff] }
 0x28d   : > { %v1254_v24 = vadd.f32 %v1210_v54, %v1190_v35  ;;  %v1290_v54 = vld [vmem:[#allocation3 + $0x20] sm:$0xff] }
 0x28e   : > { %1273 = vst.msk [vmem:[#allocation2 + $0x18] sm:$0xff] %vm4053_vm10, %v1256_v19  ;;  %vm4069_vm10 = vmmov %vm4059_vm0 }
 0x28f   : > { %1271 = vst.msk [vmem:[#allocation2 + $0x8] sm:$0xff] %vm4054_vm11, %v1254_v24  ;;  %v1222_v2 = vpop.xlane.xlu1 %1221  ;;  %vm4070_vm11 = vmmov %vm4059_vm0 }
 0x290   : > { %v1219_v53 = vpop.xlane.xlu0 %1218  ;;  %v1258_v12 = vadd.f32 %v1222_v2, %v1194_v6  ;;  %v1293_v2 = vld [vmem:[#allocation3 + $0x38] sm:$0xff] }
 0x291   : > { %v1257_v33 = vadd.f32 %v1219_v53, %v1193_v52  ;;  %v1292_v53 = vld [vmem:[#allocation3 + $0x30] sm:$0xff] }
 0x292   : > { %1275 = vst.msk [vmem:[#allocation2 + $0x28] sm:$0xff] %vm4055_vm13, %v1258_v12  ;;  %vm4071_vm13 = vmmov %vm4059_vm0 }
 0x293   : > { %1274 = vst.msk [vmem:[#allocation2 + $0x20] sm:$0xff] %vm4056_vm12, %v1257_v33  ;;  %v1228_v16 = vpop.xlane.xlu1 %1227  ;;  %vm4072_vm12 = vmmov %vm4059_vm0 }
 0x294   : > { %v1225_v3 = vpop.xlane.xlu0 %1224  ;;  %v1260_v15 = vadd.f32 %v1228_v16, %v1196_v61  ;;  %v1295_v16 = vld [vmem:[#allocation3 + $0x48] sm:$0xff] }
 0x295   : > { %v1259_v49 = vadd.f32 %v1225_v3, %v1195_v9  ;;  %v1294_v3 = vld [vmem:[#allocation3 + $0x40] sm:$0xff] }
 0x296   : > { %1277 = vst.msk [vmem:[#allocation2 + $0x38] sm:$0xff] %vm4057_vm14, %v1260_v15  ;;  %vm4073_vm14 = vmmov %vm4059_vm0 }
 0x297   : > { %1276 = vst.msk [vmem:[#allocation2 + $0x30] sm:$0xff] %vm4058_vm15, %v1259_v49  ;;  %v1234_v10 = vpop.xlane.xlu1 %1233  ;;  %vm4074_vm15 = vmmov %vm4059_vm0 }
 0x298   : > { %v1231_v51 = vpop.xlane.xlu0 %1230  ;;  %v1262_v8 = vadd.f32 %v1234_v10, %v1198_v20  ;;  %v1297_v10 = vld [vmem:[#allocation3 + $0x58] sm:$0xff] }
 0x299   : > { %v1261_v29 = vadd.f32 %v1231_v51, %v1197_v11  ;;  %v1296_v51 = vld [vmem:[#allocation3 + $0x50] sm:$0xff] }
 0x29a   : > { %1279 = vst.msk [vmem:[#allocation2 + $0x48] sm:$0xff] %vm4059_vm0, %v1262_v8 }
 0x29b   : > { %1278 = vst.msk [vmem:[#allocation2 + $0x40] sm:$0xff] %vm4060_vm1, %v1261_v29  ;;  %v1240_v30 = vpop.xlane.xlu1 %1239  ;;  %vm4075_vm1 = vmmov %vm4059_vm0 }
 0x29c   : > { %v1237_v31 = vpop.xlane.xlu0 %1236  ;;  %v1264_v26 = vadd.f32 %v1240_v30, %v1200_v58  ;;  %v1299_v30 = vld [vmem:[#allocation3 + $0x68] sm:$0xff] }
 0x29d   : > { %v1263_v21 = vadd.f32 %v1237_v31, %v1199_v34  ;;  %v1298_v31 = vld [vmem:[#allocation3 + $0x60] sm:$0xff] }
 0x29e   : > { %1281 = vst.msk [vmem:[#allocation2 + $0x58] sm:$0xff] %vm4061_vm2, %v1264_v26  ;;  %vm4076_vm2 = vmmov %vm4059_vm0 }
 0x29f   : > { %1280 = vst.msk [vmem:[#allocation2 + $0x50] sm:$0xff] %vm4062_vm3, %v1263_v21  ;;  %v1246_v13 = vpop.xlane.xlu1 %1245  ;;  %vm4077_vm3 = vmmov %vm4059_vm0 }
 0x2a0   : > { %v1243_v62 = vpop.xlane.xlu0 %1242  ;;  %v1266_v60 = vadd.f32 %v1246_v13, %v1202_v5  ;;  %v1301_v13 = vld [vmem:[#allocation3 + $0x78] sm:$0xff] }
 0x2a1   : > { %v1265_v23 = vadd.f32 %v1243_v62, %v1201_v22  ;;  %v1300_v62 = vld [vmem:[#allocation3 + $0x70] sm:$0xff] }
 0x2a2   : > { %1283 = vst.msk [vmem:[#allocation2 + $0x68] sm:$0xff] %vm4063_vm4, %v1266_v60  ;;  %vm4078_vm4 = vmmov %vm4059_vm0 }
 0x2a3   : > { %1282 = vst.msk [vmem:[#allocation2 + $0x60] sm:$0xff] %vm4064_vm5, %v1265_v23  ;;  %v1252_v57 = vpop.xlane.xlu1 %1251  ;;  %vm4079_vm5 = vmmov %vm4059_vm0 }
 0x2a4   : > { %v1249_v27 = vpop.xlane.xlu0 %1248  ;;  %v1268_v63 = vadd.f32 %v1252_v57, %v1204_v32 }
 0x2a5   : > { %v1267_v0 = vadd.f32 %v1249_v27, %v1203_v17 }
 0x2a6   : > { %1285 = vst.msk [vmem:[#allocation2 + $0x78] sm:$0xff] %vm4065_vm6, %v1268_v63  ;;  %vm4080_vm6 = vmmov %vm4059_vm0 }
 0x2a7   : > { %1284 = vst.msk [vmem:[#allocation2 + $0x70] sm:$0xff] %vm4066_vm7, %v1267_v0  ;;  %v1339_v50 = vpop.xlane.xlu1 %1338  ;;  %vm4081_vm7 = vmmov %vm4059_vm0 }
 0x2a8   : > { %v1336_v56 = vpop.xlane.xlu0 %1335  ;;  %v1383_v1 = vadd.f32 %v1339_v50, %v1287_v25 }
 0x2a9   : > { %v1382_v14 = vadd.f32 %v1336_v56, %v1286_v4 }
 0x2aa   : > { %1399 = vst.msk [vmem:[#allocation3 + $0x8] sm:$0xff] %vm4067_vm8, %v1383_v1 }
 0x2ab   : > { %1398 = vst.msk [vmem:[#allocation3] sm:$0xff] %vm4068_vm9, %v1382_v14  ;;  %v1345_v59 = vpop.xlane.xlu1 %1344 }
 0x2ac   : > { %v1342_v55 = vpop.xlane.xlu0 %1341  ;;  %v1385_v18 = vadd.f32 %v1345_v59, %v1289_v7 }
 0x2ad   : > { %v1384_v35 = vadd.f32 %v1342_v55, %v1288_v28 }
 0x2ae   : > { %1401 = vst.msk [vmem:[#allocation3 + $0x18] sm:$0xff] %vm4069_vm10, %v1385_v18 }
 0x2af   : > { %1400 = vst.msk [vmem:[#allocation3 + $0x10] sm:$0xff] %vm4070_vm11, %v1384_v35  ;;  %v1351_v19 = vpop.xlane.xlu1 %1350 }
 0x2b0   : > { %v1348_v24 = vpop.xlane.xlu0 %1347  ;;  %v1387_v6 = vadd.f32 %v1351_v19, %v1291_v36 }
 0x2b1   : > { %v1386_v52 = vadd.f32 %v1348_v24, %v1290_v54 }
 0x2b2   : > { %1403 = vst.msk [vmem:[#allocation3 + $0x28] sm:$0xff] %vm4071_vm13, %v1387_v6 }
 0x2b3   : > { %1402 = vst.msk [vmem:[#allocation3 + $0x20] sm:$0xff] %vm4072_vm12, %v1386_v52  ;;  %v1357_v12 = vpop.xlane.xlu1 %1356 }
 0x2b4   : > { %v1354_v33 = vpop.xlane.xlu0 %1353  ;;  %v1389_v61 = vadd.f32 %v1357_v12, %v1293_v2 }
 0x2b5   : > { %v1388_v9 = vadd.f32 %v1354_v33, %v1292_v53 }
 0x2b6   : > { %1405 = vst.msk [vmem:[#allocation3 + $0x38] sm:$0xff] %vm4073_vm14, %v1389_v61 }
 0x2b7   : > { %1404 = vst.msk [vmem:[#allocation3 + $0x30] sm:$0xff] %vm4074_vm15, %v1388_v9  ;;  %v1363_v15 = vpop.xlane.xlu1 %1362 }
 0x2b8   : > { %v1360_v49 = vpop.xlane.xlu0 %1359  ;;  %v1391_v20 = vadd.f32 %v1363_v15, %v1295_v16 }
 0x2b9   : > { %v1390_v11 = vadd.f32 %v1360_v49, %v1294_v3 }
 0x2ba   : > { %1407 = vst.msk [vmem:[#allocation3 + $0x48] sm:$0xff] %vm4059_vm0, %v1391_v20 }
 0x2bb   : > { %1406 = vst.msk [vmem:[#allocation3 + $0x40] sm:$0xff] %vm4075_vm1, %v1390_v11  ;;  %v1369_v8 = vpop.xlane.xlu1 %1368 }
 0x2bc   : > { %v1366_v29 = vpop.xlane.xlu0 %1365  ;;  %v1393_v58 = vadd.f32 %v1369_v8, %v1297_v10 }
 0x2bd   : > { %v1392_v34 = vadd.f32 %v1366_v29, %v1296_v51 }
 0x2be   : > { %1409 = vst.msk [vmem:[#allocation3 + $0x58] sm:$0xff] %vm4076_vm2, %v1393_v58 }
 0x2bf   : > { %1408 = vst.msk [vmem:[#allocation3 + $0x50] sm:$0xff] %vm4077_vm3, %v1392_v34  ;;  %v1375_v26 = vpop.xlane.xlu1 %1374 }
 0x2c0   : > { %v1372_v21 = vpop.xlane.xlu0 %1371  ;;  %v1395_v5 = vadd.f32 %v1375_v26, %v1299_v30 }
 0x2c1   : > { %v1394_v22 = vadd.f32 %v1372_v21, %v1298_v31 }
 0x2c2   : > { %1411 = vst.msk [vmem:[#allocation3 + $0x68] sm:$0xff] %vm4078_vm4, %v1395_v5 }
 0x2c3   : > { %1410 = vst.msk [vmem:[#allocation3 + $0x60] sm:$0xff] %vm4079_vm5, %v1394_v22  ;;  %v1381_v60 = vpop.xlane.xlu1 %1380 }
 0x2c4   : > { %v1378_v23 = vpop.xlane.xlu0 %1377  ;;  %v1397_v32 = vadd.f32 %v1381_v60, %v1301_v13 }
 0x2c5   : > { %v1396_v17 = vadd.f32 %v1378_v23, %v1300_v62 }
 0x2c6   : > { %1413 = vst.msk [vmem:[#allocation3 + $0x78] sm:$0xff] %vm4080_vm6, %v1397_v32 }
 0x2c7   : > { %1412 = vst.msk [vmem:[#allocation3 + $0x70] sm:$0xff] %vm4081_vm7, %v1396_v17 }
 0x2c8 PF: > { %v2313_v57 = vld [vmem:[%s3803_s5] sm:$0xff]   ;;  %vm4083_vm8 = vcmask 261120   ;;  %v4084_v63 = vlaneseq  ;;  %v2314_v25 = vld [vmem:[%s3803_s5 + $0x8] sm:$0xff]   ;;  %vm1613_vm9 = vcmask 31744   ;;  %v4085_v36 = vld [vmem:[#allocation6_spill] sm:$0xff] }
 0x2c9   : > { %v4082_v27 = vld [vmem:[#allocation4_spill] sm:$0xff]  ;;  %2183 = vmatprep.subr.bf16.mxu1 %v2313_v57  ;;  %vm4086_vm2 = vmmov %vm4083_vm8  ;;  %v4089_v33 = vld [vmem:[#allocation17_spill] sm:$0xff] }
 0x2ca   : > { %2187 = vmatprep.mubr.msk.bf16.mxu1 %vm4083_vm8, %v4082_v27  ;;  %v3462_v0 = vand.u32 127, %v4084_v63  ;;  %v3470_v4 = vld [vmem:[%s3804_s6] ss:$0 sm:$0xff]  ;;  %2184 = vmatpush3.bf16.msra.mxu1 %v2313_v57  ;;  %vm4088_vm3 = vmmov %vm4086_vm2  ;;  %v4091_v9 = vld [vmem:[#allocation22_spill] sm:$0xff] }
 0x2cb   : > { %2185 = vmatprep.subr.bf16.mxu1 %v2314_v25  ;;  %v4087_v24 = vld [vmem:[#allocation12_spill] sm:$0xff]  ;;  %vm4090_vm5 = vmmov %vm4086_vm2  ;;  %v4093_v16 = vld [vmem:[#allocation27_spill] sm:$0xff] }
 0x2cc   : > { %vm1565_vm10 = vcmp.eq.s32.totalorder %v3462_v0, %v2689_v38  ;;  %vm1567_vm11 = vcmp.eq.s32.totalorder %v3462_v0, %v2687_v37  ;;  %vm1566_vm13 = vcmp.eq.s32.totalorder %v3462_v0, %v2705_v40  ;;  %vm1568_vm12 = vcmp.eq.s32.totalorder %v3462_v0, %v2703_v39  ;;  %vm4092_vm6 = vmmov %vm4086_vm2  ;;  %v4095_v3 = vld [vmem:[#allocation5_spill] sm:$0xff]  ;;  %v4099_v34 = vld [vmem:[#allocation28_spill] sm:$0xff] }
 0x2cd   : > { %v1732_v50 = vsel %vm1565_vm10, %v3470_v4, 0.0  ;;  %v1734_v56 = vsel %vm1567_vm11, %v3470_v4, 0.0  ;;  %v1733_v1 = vsel %vm1566_vm13, %v3470_v4, 0.0  ;;  %v1735_v14 = vsel %vm1568_vm12, %v3470_v4, 0.0  ;;  %vm4094_vm7 = vmmov %vm4086_vm2  ;;  %v4097_v15 = vld [vmem:[#allocation9_spill] sm:$0xff]  ;;  %v4100_v30 = vld [vmem:[#allocation31_spill] sm:$0xff] }
 0x2ce   : > { %v1748_v7 = vsel %vm1613_vm9, %v1732_v50, 0.0  ;;  %v1754_v28 = vsel %vm1613_vm9, %v1734_v56, 0.0  ;;  %vm1569_vm14 = vcmp.eq.s32.totalorder %v3462_v0, %v2722_v42  ;;  %vm1570_vm15 = vcmp.eq.s32.totalorder %v3462_v0, %v2720_v41  ;;  %2186 = vmatpush3.bf16.msra.mxu1 %v2314_v25  ;;  %vm4096_vm8 = vmmov %vm4086_vm2  ;;  %v4098_v29 = vld [vmem:[#allocation29_spill] sm:$0xff]  ;;  %v4101_v13 = vld [vmem:[#allocation30_spill] sm:$0xff] }
 0x2cf   : > { %1749 = vadd.xlane.f32.xlu0 %v1748_v7  ;;  %1755 = vadd.xlane.f32.xlu1 %v1754_v28  ;;  %v1751_v59 = vsel %vm1613_vm9, %v1733_v1, 0.0  ;;  %v1757_v55 = vsel %vm1613_vm9, %v1735_v14, 0.0  ;;  %v1736_v18 = vsel %vm1569_vm14, %v3470_v4, 0.0  ;;  %v1737_v35 = vsel %vm1570_vm15, %v3470_v4, 0.0 }
 0x2d0   : > { %vm1571_vm0 = vcmp.eq.s32.totalorder %v3462_v0, %v2734_v44  ;;  %vm1572_vm1 = vcmp.eq.s32.totalorder %v3462_v0, %v2732_v43  ;;  %v1760_v54 = vsel %vm1613_vm9, %v1736_v18, 0.0  ;;  %v1763_v19 = vsel %vm1613_vm9, %v1737_v35, 0.0 }
 0x2d1   : > { %2188 = vmatmul.mubr.msk.bf16.vlgmr.msra.gmra.mrb[8].mxu1 %vm4086_vm2, %v4085_v36  ;;  %v1738_v6 = vsel %vm1571_vm0, %v3470_v4, 0.0  ;;  %v1739_v52 = vsel %vm1572_vm1, %v3470_v4, 0.0  ;;  %vm1573_vm4 = vcmp.eq.s32.totalorder %v3462_v0, %v2746_v46 }
 0x2d2   : > { %2191 = vmatprep.mubr.msk.bf16.mxu1 %vm4088_vm3, %v4087_v24  ;;  %v1766_v2 = vsel %vm1613_vm9, %v1738_v6, 0.0  ;;  %v1769_v53 = vsel %vm1613_vm9, %v1739_v52, 0.0  ;;  %v1740_v12 = vsel %vm1573_vm4, %v3470_v4, 0.0  ;;  %vm1574_vm3 = vcmp.eq.s32.totalorder %v3462_v0, %v2744_v45 }
 0x2d3   : > { %1752 = vadd.xlane.f32.xlu0 %v1751_v59  ;;  %1758 = vadd.xlane.f32.xlu1 %v1757_v55  ;;  %v1772_v61 = vsel %vm1613_vm9, %v1740_v12, 0.0  ;;  %v1741_v49 = vsel %vm1574_vm3, %v3470_v4, 0.0 }
 0x2d4   : > { %v1775_v20 = vsel %vm1613_vm9, %v1741_v49, 0.0 }
 0x2d7   : > { %1761 = vadd.xlane.f32.xlu0 %v1760_v54  ;;  %1764 = vadd.xlane.f32.xlu1 %v1763_v19 }
 0x2d9   : > { %2192 = vmatmul.mubr.msk.bf16.gmra.mrb[12].mxu1 %vm4090_vm5, %v4089_v33  ;;  %vm1575_vm5 = vcmp.eq.s32.totalorder %v3462_v0, %v2758_v48 }
 0x2da   : > { %2195 = vmatprep.mubr.msk.bf16.mxu1 %vm4092_vm6, %v4091_v9  ;;  %v1742_v11 = vsel %vm1575_vm5, %v3470_v4, 0.0  ;;  %vm1576_vm6 = vcmp.eq.s32.totalorder %v3462_v0, %v2756_v47 }
 0x2db   : > { %1767 = vadd.xlane.f32.xlu0 %v1766_v2  ;;  %1770 = vadd.xlane.f32.xlu1 %v1769_v53  ;;  %v1778_v10 = vsel %vm1613_vm9, %v1742_v11, 0.0  ;;  %v1743_v51 = vsel %vm1576_vm6, %v3470_v4, 0.0 }
 0x2dc   : > { %v1781_v8 = vsel %vm1613_vm9, %v1743_v51, 0.0 }
 0x2df   : > { %1773 = vadd.xlane.f32.xlu0 %v1772_v61  ;;  %1776 = vadd.xlane.f32.xlu1 %v1775_v20 }
 0x2e1   : > { %2196 = vmatmul.mubr.msk.bf16.gmra.mrb[16].mxu1 %vm4094_vm7, %v4093_v16  ;;  %vm3897_vm7 = vcmp.eq.s32.totalorder %v3462_v0, %v4098_v29 }
 0x2e2   : > { %2199 = vmatprep.mubr.msk.bf16.mxu1 %vm4096_vm8, %v4095_v3  ;;  %v1744_v58 = vsel %vm3897_vm7, %v3470_v4, 0.0  ;;  %vm1578_vm8 = vcmp.eq.s32.totalorder %v3462_v0, %v4099_v34  ;;  %vm1580_vm7 = vcmp.eq.s32.totalorder %v3462_v0, %v4101_v13 }
 0x2e3   : > { %1779 = vadd.xlane.f32.xlu0 %v1778_v10  ;;  %1782 = vadd.xlane.f32.xlu1 %v1781_v8  ;;  %v1784_v31 = vsel %vm1613_vm9, %v1744_v58, 0.0  ;;  %v1745_v26 = vsel %vm1578_vm8, %v3470_v4, 0.0  ;;  %v1747_v62 = vsel %vm1580_vm7, %v3470_v4, 0.0 }
 0x2e4   : > { %v1787_v5 = vsel %vm1613_vm9, %v1745_v26, 0.0  ;;  %v1793_v60 = vsel %vm1613_vm9, %v1747_v62, 0.0 }
 0x2e7   : > { %1785 = vadd.xlane.f32.xlu0 %v1784_v31  ;;  %1788 = vadd.xlane.f32.xlu1 %v1787_v5 }
 0x2e9   : > { %2200 = vmatmul.mubr.msk.bf16.gmra.mrb[20].mxu1 %vm4086_vm2, %v4097_v15  ;;  %vm1579_vm2 = vcmp.eq.s32.totalorder %v3462_v0, %v4100_v30 }
 0x2ea   : > { %v1746_v21 = vsel %vm1579_vm2, %v3470_v4, 0.0 }
 0x2eb   : > { %v1790_v22 = vsel %vm1613_vm9, %v1746_v21, 0.0  ;;  %1794 = vadd.xlane.f32.xlu1 %v1793_v60 }
 0x2ec   : > { %1791 = vadd.xlane.f32.xlu0 %v1790_v22 }
 0x3a4   : > { %v2189_v23 = vpop.f32.mrb[8].mxu1 }
 0x3a5   : > { %v1535_v32 = vmul.f32 1.442695, %v2189_v23  ;;  %v1468_v17 = vpop.f32.mrb[9].mxu1 }
 0x3a6   : > { %v2190_v57 = vpop.f32.mrb[10].mxu1  ;;  %v1531_v27 = vmul.f32 1.442695, %v1468_v17 }
 0x3a7   : > { %2315 = vpow2.f32 %v1535_v32  ;;  %v1537_v63 = vmul.f32 1.442695, %v2190_v57  ;;  %v1471_v25 = vpop.f32.mrb[11].mxu1 }
 0x3a8   : > { %v1533_v50 = vmul.f32 1.442695, %v1471_v25 }
 0x3a9   : > { %2317 = vpow2.f32 %v1537_v63 }
 0x3aa   : > { %2319 = vpow2.f32 %v1531_v27 }
 0x3ab   : > { %2321 = vpow2.f32 %v1533_v50 }
 0x3ac   : > { %v2193_v56 = vpop.f32.mrb[12].mxu1 }
 0x3ad   : > { %v1543_v1 = vmul.f32 1.442695, %v2193_v56  ;;  %v1484_v14 = vpop.f32.mrb[13].mxu1 }
 0x3ae   : > { %v2194_v7 = vpop.f32.mrb[14].mxu1  ;;  %v1539_v33 = vmul.f32 1.442695, %v1484_v14 }
 0x3af   : > { %v1487_v28 = vpop.f32.mrb[15].mxu1  ;;  %2323 = vpow2.f32 %v1543_v1  ;;  %v1545_v55 = vmul.f32 1.442695, %v2194_v7 }
 0x3b0   : > { %v1541_v16 = vmul.f32 1.442695, %v1487_v28 }
 0x3b1   : > { %v2316_v59 = vpop.eup %2315  ;;  %2325 = vpow2.f32 %v1545_v55 }
 0x3b2   : > { %v1599_v18 = vsel %vm1567_vm11, %v2316_v59, 0.0  ;;  %v1670_v54 = vmul.f32 %v2316_v59, %v3470_v4  ;;  %2327 = vpow2.f32 %v1539_v33 }
 0x3b3   : > { %v2318_v35 = vpop.eup %2317  ;;  %v1620_v36 = vsel %vm1613_vm9, %v1599_v18, 0.0  ;;  %2329 = vpow2.f32 %v1541_v16 }
 0x3b4   : > { %1621 = vadd.xlane.f32.xlu0 %v1620_v36  ;;  %v1600_v19 = vsel %vm1568_vm12, %v2318_v35, 0.0  ;;  %v2197_v24 = vpop.f32.mrb[16].mxu1  ;;  %v2320_v6 = vpop.eup %2319  ;;  %v1671_v2 = vmul.f32 %v2318_v35, %v3470_v4  ;;  %v1690_v61 = vsel %vm1613_vm9, %v1670_v54, 0.0 }
 0x3b5   : > { %v1623_v52 = vsel %vm1613_vm9, %v1600_v19, 0.0  ;;  %v1500_v53 = vpop.f32.mrb[17].mxu1  ;;  %v2322_v12 = vpop.eup %2321  ;;  %v1597_v39 = vsel %vm1565_vm10, %v2320_v6, 0.0  ;;  %v1668_v11 = vmul.f32 %v2320_v6, %v3470_v4  ;;  %v1551_v10 = vmul.f32 1.442695, %v2197_v24 }
 0x3b6   : > { %1624 = vadd.xlane.f32.xlu1 %v1623_v52  ;;  %v2198_v37 = vpop.f32.mrb[18].mxu1  ;;  %v1693_v3 = vsel %vm1613_vm9, %v1671_v2, 0.0  ;;  %v1598_v15 = vsel %vm1566_vm13, %v2322_v12, 0.0  ;;  %v1614_v20 = vsel %vm1613_vm9, %v1597_v39, 0.0  ;;  %v1669_v8 = vmul.f32 %v2322_v12, %v3470_v4 }
 0x3b7   : > { %v1503_v9 = vpop.f32.mrb[19].mxu1  ;;  %v1617_v38 = vsel %vm1613_vm9, %v1598_v15, 0.0  ;;  %v1684_v21 = vsel %vm1613_vm9, %v1668_v11, 0.0  ;;  %2331 = vpow2.f32 %v1551_v10  ;;  %v1553_v22 = vmul.f32 1.442695, %v2198_v37 }
 0x3b8   : > { %1691 = vadd.xlane.f32.xlu0 %v1690_v61  ;;  %v1687_v62 = vsel %vm1613_vm9, %v1669_v8, 0.0  ;;  %v1547_v23 = vmul.f32 1.442695, %v1500_v53  ;;  %v1549_v44 = vmul.f32 1.442695, %v1503_v9  ;;  %vm4102_vm10 = vcmp.eq.s32.totalorder %v3462_v0, %v4098_v29 }
 0x3b9   : > { %v2324_v49 = vpop.eup %2323  ;;  %2333 = vpow2.f32 %v1553_v22  ;;  %vm4105_vm13 = vcmask 7168  }
 0x3ba   : > { %1694 = vadd.xlane.f32.xlu1 %v1693_v3  ;;  %v1603_v40 = vsel %vm1571_vm0, %v2324_v49, 0.0  ;;  %v1674_v17 = vmul.f32 %v2324_v49, %v3470_v4  ;;  %2335 = vpow2.f32 %v1547_v23  ;;  %vm4106_vm12 = vmmov %vm4105_vm13 }
 0x3bb   : > { %v2326_v26 = vpop.eup %2325  ;;  %v1632_v60 = vsel %vm1613_vm9, %v1603_v40, 0.0  ;;  %2337 = vpow2.f32 %v1549_v44  ;;  %v1756_v44 = vpop.xlane.xlu1 %1755  ;;  %vm4109_vm0 = vmmov %vm4106_vm12 }
 0x3bc   : > { %1615 = vadd.xlane.f32.xlu0 %v1614_v20  ;;  %v2201_v51 = vpop.f32.mrb[20].mxu1  ;;  %v1604_v32 = vsel %vm1572_vm1, %v2326_v26, 0.0  ;;  %v2328_v27 = vpop.eup %2327  ;;  %v1675_v25 = vmul.f32 %v2326_v26, %v3470_v4  ;;  %v1702_v56 = vsel %vm1613_vm9, %v1674_v17, 0.0  ;;  %vm4110_vm1 = vmmov %vm4109_vm0 }
 0x3bd   : > { %v1516_v58 = vpop.f32.mrb[21].mxu1  ;;  %v1559_v57 = vmul.f32 1.442695, %v2201_v51  ;;  %v1635_v63 = vsel %vm1613_vm9, %v1604_v32, 0.0  ;;  %v2330_v50 = vpop.eup %2329  ;;  %v1601_v1 = vsel %vm1569_vm14, %v2328_v27, 0.0  ;;  %v1672_v18 = vmul.f32 %v2328_v27, %v3470_v4 }
 0x3be   : > { %1618 = vadd.xlane.f32.xlu1 %v1617_v38  ;;  %v2202_v31 = vpop.f32.mrb[22].mxu1  ;;  %v1705_v14 = vsel %vm1613_vm9, %v1675_v25, 0.0  ;;  %v1555_v28 = vmul.f32 1.442695, %v1516_v58  ;;  %v1602_v59 = vsel %vm1570_vm15, %v2330_v50, 0.0  ;;  %v1626_v55 = vsel %vm1613_vm9, %v1601_v1, 0.0  ;;  %v1750_v32 = vpop.xlane.xlu0 %1749 }
 0x3bf   : > { %v1519_v5 = vpop.f32.mrb[23].mxu1  ;;  %2339 = vpow2.f32 %v1559_v57  ;;  %v1561_v43 = vmul.f32 1.442695, %v2202_v31  ;;  %v1629_v36 = vsel %vm1613_vm9, %v1602_v59, 0.0  ;;  %v1673_v42 = vmul.f32 %v2330_v50, %v3470_v4  ;;  %v1759_v57 = vpop.xlane.xlu1 %1758 }
 0x3c0   : > { %1685 = vadd.xlane.f32.xlu0 %v1684_v21  ;;  %v1557_v35 = vmul.f32 1.442695, %v1519_v5  ;;  %v1696_v24 = vsel %vm1613_vm9, %v1672_v18, 0.0 }
 0x3c1   : > { %v2332_v7 = vpop.eup %2331  ;;  %2341 = vpow2.f32 %v1561_v43  ;;  %v1699_v52 = vsel %vm1613_vm9, %v1673_v42, 0.0 }
 0x3c2   : > { %1688 = vadd.xlane.f32.xlu1 %v1687_v62  ;;  %v1678_v54 = vmul.f32 %v2332_v7, %v3470_v4  ;;  %2343 = vpow2.f32 %v1555_v28  ;;  %v1753_v17 = vpop.xlane.xlu0 %1752  ;;  %v1830_v28 = vld [vmem:[#allocation2 + $0x10] sm:$0xff] }
 0x3c3   : > { %v2334_v19 = vpop.eup %2333  ;;  %2345 = vpow2.f32 %v1557_v35  ;;  %v3696_v30 = vpop.xlane.xlu1 %1764  ;;  %v1846_v35 = vmul.f32 %v1830_v28, %v1756_v44 }
 0x3c4   : > { %1633 = vadd.xlane.f32.xlu0 %v1632_v60  ;;  %v2336_v41 = vpop.eup %2335  ;;  %v1714_v2 = vsel %vm1613_vm9, %v1678_v54, 0.0  ;;  %v1679_v53 = vmul.f32 %v2334_v19, %v3470_v4  ;;  %v1608_v46 = vsel %vm1576_vm6, %v2334_v19, 0.0  ;;  %vm4114_vm6 = vmmov %vm4109_vm0 }
 0x3c5   : > { %v2338_v6 = vpop.eup %2337  ;;  %v1676_v12 = vmul.f32 %v2336_v41, %v3470_v4  ;;  %v1605_v58 = vsel %vm1573_vm4, %v2336_v41, 0.0  ;;  %v1647_v22 = vsel %vm1613_vm9, %v1608_v46, 0.0 }
 0x3c6   : > { %1636 = vadd.xlane.f32.xlu1 %v1635_v63  ;;  %v1717_v33 = vsel %vm1613_vm9, %v1679_v53, 0.0  ;;  %v1677_v61 = vmul.f32 %v2338_v6, %v3470_v4  ;;  %v1606_v31 = vsel %vm1574_vm3, %v2338_v6, 0.0  ;;  %v1638_v26 = vsel %vm1613_vm9, %v1605_v58, 0.0  ;;  %v3694_v27 = vpop.xlane.xlu0 %1761  ;;  %v1828_v6 = vld [vmem:[#allocation2] sm:$0xff]  ;;  %v1829_v53 = vld [vmem:[#allocation2 + $0x8] sm:$0xff] }
 0x3c7   : > { %v1708_v16 = vsel %vm1613_vm9, %v1676_v12, 0.0  ;;  %v1641_v21 = vsel %vm1613_vm9, %v1606_v31, 0.0  ;;  %v1771_v25 = vpop.xlane.xlu1 %1770  ;;  %v1844_v12 = vmul.f32 %v1828_v6, %v1750_v32  ;;  %v1833_v32 = vld [vmem:[#allocation2 + $0x28] sm:$0xff] }
 0x3c8   : > { %1703 = vadd.xlane.f32.xlu0 %v1702_v56  ;;  %v1711_v15 = vsel %vm1613_vm9, %v1677_v61, 0.0  ;;  %v1845_v61 = vmul.f32 %v1829_v53, %v1753_v17  ;;  %v1839_v53 = vld [vmem:[#allocation2 + $0x58] sm:$0xff] }
 0x3c9   : > { %v2340_v37 = vpop.eup %2339 }
 0x3ca   : > { %1706 = vadd.xlane.f32.xlu1 %v1705_v14  ;;  %v1682_v9 = vmul.f32 %v2340_v37, %v3470_v4  ;;  %v1611_v47 = vsel %vm1579_vm2, %v2340_v37, 0.0  ;;  %v1768_v63 = vpop.xlane.xlu0 %1767  ;;  %vm4117_vm2 = vmmov %vm4109_vm0 }
 0x3cb   : > { %v2342_v39 = vpop.eup %2341  ;;  %v1656_v23 = vsel %vm1613_vm9, %v1611_v47, 0.0  ;;  %v3700_v0 = vpop.xlane.xlu1 %1776 }
 0x3cc   : > { %1627 = vadd.xlane.f32.xlu0 %v1626_v55  ;;  %v2344_v3 = vpop.eup %2343  ;;  %v1726_v49 = vsel %vm1613_vm9, %v1682_v9, 0.0  ;;  %v1683_v20 = vmul.f32 %v2342_v39, %v3470_v4  ;;  %v1612_v29 = vsel %vm1580_vm7, %v2342_v39, 0.0  ;;  %v1831_v55 = vld [vmem:[#allocation2 + $0x18] sm:$0xff] }
 0x3cd   : > { %v2346_v11 = vpop.eup %2345  ;;  %v1680_v10 = vmul.f32 %v2344_v3, %v3470_v4  ;;  %v1609_v45 = vsel %vm4102_vm10, %v2344_v3, 0.0  ;;  %v1659_v34 = vsel %vm1613_vm9, %v1612_v29, 0.0  ;;  %v1847_v42 = vmul.f32 %v1831_v55, %v1759_v57  ;;  %vm4118_vm10 = vmmov %vm4109_vm0 }
 0x3ce   : > { %1630 = vadd.xlane.f32.xlu1 %v1629_v36  ;;  %v1729_v51 = vsel %vm1613_vm9, %v1683_v20, 0.0  ;;  %v1681_v38 = vmul.f32 %v2346_v11, %v3470_v4  ;;  %v1607_v4 = vsel %vm1575_vm5, %v2332_v7, 0.0  ;;  %v1610_v48 = vsel %vm1578_vm8, %v2346_v11, 0.0  ;;  %v3698_v50 = vpop.xlane.xlu0 %1773  ;;  %v1799_v11 = vld [vmem:[#allocation3 + $0x18] sm:$0xff]  ;;  %vm4113_vm5 = vmmov %vm4109_vm0 }
 0x3cf   : > { %v1720_v8 = vsel %vm1613_vm9, %v1680_v10, 0.0  ;;  %v1644_v5 = vsel %vm1613_vm9, %v1607_v4, 0.0  ;;  %v1650_v62 = vsel %vm1613_vm9, %v1609_v45, 0.0  ;;  %v1653_v60 = vsel %vm1613_vm9, %v1610_v48, 0.0  ;;  %v3704_v56 = vpop.xlane.xlu1 %1782  ;;  %v1796_v48 = vld [vmem:[#allocation3] sm:$0xff] }
 0x3d0   : > { %1697 = vadd.xlane.f32.xlu0 %v1696_v24  ;;  %v1723_v40 = vsel %vm1613_vm9, %v1681_v38, 0.0 }
 0x3d2   : > { %1700 = vadd.xlane.f32.xlu1 %v1699_v52  ;;  %v3702_v13 = vpop.xlane.xlu0 %1779 }
 0x3d3   : > { %v3708_v1 = vpop.xlane.xlu1 %1788 }
 0x3d4   : > { %1715 = vadd.xlane.f32.xlu0 %v1714_v2 }
 0x3d6   : > { %1718 = vadd.xlane.f32.xlu1 %v1717_v33  ;;  %v3706_v43 = vpop.xlane.xlu0 %1785 }
 0x3d7   : > { %v3712_v7 = vpop.xlane.xlu1 %1794 }
 0x3d8   : > { %1709 = vadd.xlane.f32.xlu0 %v1708_v16  ;;  %v1798_v16 = vld [vmem:[#allocation3 + $0x10] sm:$0xff] }
 0x3da   : > { %1712 = vadd.xlane.f32.xlu1 %v1711_v15  ;;  %v3710_v14 = vpop.xlane.xlu0 %1791 }
 0x3dc   : > { %1727 = vadd.xlane.f32.xlu0 %v1726_v49  ;;  %v1834_v49 = vld [vmem:[#allocation2 + $0x30] sm:$0xff] }
 0x3de   : > { %1730 = vadd.xlane.f32.xlu1 %v1729_v51  ;;  %v1835_v51 = vld [vmem:[#allocation2 + $0x38] sm:$0xff] }
 0x3df   : > { %v1851_v46 = vmul.f32 %v1835_v51, %v1771_v25 }
 0x3e0   : > { %1721 = vadd.xlane.f32.xlu0 %v1720_v8 }
 0x3e2   : > { %1724 = vadd.xlane.f32.xlu1 %v1723_v40  ;;  %v1850_v40 = vmul.f32 %v1834_v49, %v1768_v63 }
 0x3e4   : > { %1639 = vadd.xlane.f32.xlu0 %v1638_v26 }
 0x3e6   : > { %1642 = vadd.xlane.f32.xlu1 %v1641_v21 }
 0x3e8   : > { %1645 = vadd.xlane.f32.xlu0 %v1644_v5 }
 0x3ea   : > { %1648 = vadd.xlane.f32.xlu1 %v1647_v22 }
 0x3ec   : > { %1651 = vadd.xlane.f32.xlu0 %v1650_v62 }
 0x3ee   : > { %1654 = vadd.xlane.f32.xlu1 %v1653_v60  ;;  %v1832_v60 = vld [vmem:[#allocation2 + $0x20] sm:$0xff] }
 0x3ef   : > { %v1848_v63 = vmul.f32 %v1832_v60, %v3694_v27 }
 0x3f0   : > { %1657 = vadd.xlane.f32.xlu0 %v1656_v23  ;;  %v1797_v23 = vld [vmem:[#allocation3 + $0x8] sm:$0xff] }
 0x3f2   : > { %1660 = vadd.xlane.f32.xlu1 %v1659_v34 }
 0x441   : > { %v1622_v59 = vpop.xlane.xlu0 %1621 }
 0x442   : > { %v1814_v38 = vadd.f32 %v1798_v16, %v1622_v59  ;;  %v4103_v16 = vld [vmem:[#allocation7_spill] sm:$0xff] }
 0x443   : > { %v1625_v18 = vpop.xlane.xlu1 %1624  ;;  %vm1583_vm9 = vcmp.ne.s32.totalorder %v4103_v16, 4294967295  ;;  %v1805_v16 = vld [vmem:[#allocation3 + $0x48] sm:$0xff] }
 0x444   : > { %v1815_v31 = vadd.f32 %v1799_v11, %v1625_v18  ;;  %v1849_v18 = vmul.f32 %v1833_v32, %v3696_v30  ;;  %v1855_v11 = vmul.f32 %v1839_v53, %v3704_v56  ;;  %v1801_v32 = vld [vmem:[#allocation3 + $0x28] sm:$0xff] }
 0x445   : > { %v1692_v36 = vpop.xlane.xlu0 %1691 }
 0x446   : > { %v1862_v54 = vadd.f32 %v1846_v35, %v1692_v36  ;;  %v1836_v36 = vld [vmem:[#allocation2 + $0x40] sm:$0xff] }
 0x447   : > { %v1695_v19 = vpop.xlane.xlu1 %1694 }
 0x448   : > { %v1878_v24 = vadd.f32 1e-12, %v1862_v54  ;;  %v1863_v41 = vadd.f32 %v1847_v42, %v1695_v19  ;;  %v1837_v19 = vld [vmem:[#allocation2 + $0x48] sm:$0xff] }
 0x449   : > { %v1616_v52 = vpop.xlane.xlu0 %1615 }
 0x44a   : > { %2347 = vrcp.f32 %v1878_v24  ;;  %v1879_v2 = vadd.f32 1e-12, %v1863_v41  ;;  %v1812_v44 = vadd.f32 %v1796_v48, %v1616_v52  ;;  %v1838_v24 = vld [vmem:[#allocation2 + $0x50] sm:$0xff]  ;;  %v1800_v48 = vld [vmem:[#allocation3 + $0x20] sm:$0xff] }
 0x44b   : > { %v1619_v37 = vpop.xlane.xlu1 %1618  ;;  %v1802_v41 = vld [vmem:[#allocation3 + $0x30] sm:$0xff] }
 0x44c   : > { %2349 = vrcp.f32 %v1879_v2  ;;  %v1813_v25 = vadd.f32 %v1797_v23, %v1619_v37  ;;  %v1852_v37 = vmul.f32 %v1836_v36, %v3698_v50  ;;  %v4104_v50 = vld [vmem:[#allocation10_spill] sm:$0xff] }
 0x44d   : > { %v1686_v33 = vpop.xlane.xlu0 %1685  ;;  %vm1584_vm11 = vcmp.ne.s32.totalorder %v4104_v50, 4294967295 }
 0x44e   : > { %v1860_v9 = vadd.f32 %v1844_v12, %v1686_v33  ;;  %v1803_v33 = vld [vmem:[#allocation3 + $0x38] sm:$0xff] }
 0x44f   : > { %v1689_v39 = vpop.xlane.xlu1 %1688 }
 0x450   : > { %v1876_v3 = vadd.f32 1e-12, %v1860_v9  ;;  %v1861_v15 = vadd.f32 %v1845_v61, %v1689_v39  ;;  %v1853_v9 = vmul.f32 %v1837_v19, %v3700_v0  ;;  %v1854_v39 = vmul.f32 %v1838_v24, %v3702_v13  ;;  %v1840_v13 = vld [vmem:[#allocation2 + $0x60] sm:$0xff] }
 0x451   : > { %v1634_v20 = vpop.xlane.xlu0 %1633  ;;  %v1856_v23 = vmul.f32 %v1840_v13, %v3706_v43  ;;  %v4112_v13 = vld [vmem:[#allocation15_spill] sm:$0xff] }
 0x452   : > { %2351 = vrcp.f32 %v1876_v3  ;;  %v1877_v10 = vadd.f32 1e-12, %v1861_v15  ;;  %v1818_v3 = vadd.f32 %v1802_v41, %v1634_v20  ;;  %vm1588_vm3 = vcmp.ne.s32.totalorder %v4112_v13, 4294967295 }
 0x453   : > { %v3714_v8 = vpop.xlane.xlu1 %1636 }
 0x454   : > { %v2348_v58 = vpop.eup %2347  ;;  %2353 = vrcp.f32 %v1877_v10 }
 0x455   : > { %v1897_v26 = vmul.f32 %v2348_v58, %v1814_v38  ;;  %v1704_v4 = vpop.xlane.xlu0 %1703  ;;  %v1819_v38 = vadd.f32 %v1803_v33, %v3714_v8  ;;  %v1843_v8 = vld [vmem:[#allocation2 + $0x78] sm:$0xff] }
 0x456   : > { %v2350_v21 = vpop.eup %2349  ;;  %v1866_v5 = vadd.f32 %v1850_v40, %v1704_v4 }
 0x457   : > { %2355 = vlog2.f32 %v1897_v26  ;;  %v1899_v45 = vmul.f32 %v2350_v21, %v1815_v31  ;;  %v1707_v22 = vpop.xlane.xlu1 %1706  ;;  %v1841_v26 = vld [vmem:[#allocation2 + $0x68] sm:$0xff] }
 0x458   : > { %v1882_v62 = vadd.f32 1e-12, %v1866_v5  ;;  %v1867_v47 = vadd.f32 %v1851_v46, %v1707_v22  ;;  %v1842_v46 = vld [vmem:[#allocation2 + $0x70] sm:$0xff] }
 0x459   : > { %2357 = vlog2.f32 %v1899_v45  ;;  %v3716_v29 = vpop.xlane.xlu0 %1627 }
 0x45a   : > { %2359 = vrcp.f32 %v1882_v62  ;;  %v1883_v34 = vadd.f32 1e-12, %v1867_v47  ;;  %v1816_v43 = vadd.f32 %v1800_v48, %v3716_v29  ;;  %v1808_v48 = vld [vmem:[#allocation3 + $0x60] sm:$0xff] }
 0x45b   : > { %v3718_v17 = vpop.xlane.xlu1 %1630 }
 0x45c   : > { %v2352_v57 = vpop.eup %2351  ;;  %2361 = vrcp.f32 %v1883_v34  ;;  %v1857_v34 = vmul.f32 %v1841_v26, %v3708_v1 }
 0x45d   : > { %v1893_v28 = vmul.f32 %v2352_v57, %v1812_v44  ;;  %v1698_v59 = vpop.xlane.xlu0 %1697 }
 0x45e   : > { %v2354_v55 = vpop.eup %2353  ;;  %v1864_v35 = vadd.f32 %v1848_v63, %v1698_v59  ;;  %v1858_v63 = vmul.f32 %v1842_v46, %v3710_v14  ;;  %v1817_v14 = vadd.f32 %v1801_v32, %v3718_v17 }
 0x45f   : > { %2363 = vlog2.f32 %v1893_v28  ;;  %v1895_v42 = vmul.f32 %v2354_v55, %v1813_v25  ;;  %v1701_v54 = vpop.xlane.xlu1 %1700 }
 0x460   : > { %v1880_v6 = vadd.f32 1e-12, %v1864_v35  ;;  %v1865_v52 = vadd.f32 %v1849_v18, %v1701_v54  ;;  %v1859_v18 = vmul.f32 %v1843_v8, %v3712_v7  ;;  %v4107_v35 = vld [vmem:[#allocation8_spill] sm:$0xff]  ;;  %v4108_v54 = vld [vmem:[#allocation11_spill] sm:$0xff] }
 0x461   : > { %v2356_v2 = vpop.eup %2355  ;;  %2365 = vlog2.f32 %v1895_v42  ;;  %v1716_v27 = vpop.xlane.xlu0 %1715  ;;  %vm1581_vm14 = vcmp.ne.s32.totalorder %v4107_v35, 4294967295  ;;  %vm1582_vm15 = vcmp.ne.s32.totalorder %v4108_v54, 4294967295 }
 0x462   : > { %v1929_v12 = vmul.f32 0.6931472, %v2356_v2  ;;  %2367 = vrcp.f32 %v1880_v6  ;;  %v1881_v30 = vadd.f32 1e-12, %v1865_v52  ;;  %v1870_v40 = vadd.f32 %v1854_v39, %v1716_v27 }
 0x463   : > { %v2358_v61 = vpop.eup %2357  ;;  %v1719_v15 = vpop.xlane.xlu1 %1718 }
 0x464   : > { %v2360_v49 = vpop.eup %2359  ;;  %v1958_v10 = vsub.f32 0.0, %v1929_v12  ;;  %v1931_v51 = vmul.f32 0.6931472, %v2358_v61  ;;  %2369 = vrcp.f32 %v1881_v30  ;;  %v1871_v56 = vadd.f32 %v1855_v11, %v1719_v15  ;;  %v1804_v12 = vld [vmem:[#allocation3 + $0x40] sm:$0xff] }
 0x465   : > { %v1905_v58 = vmul.f32 %v2360_v49, %v1818_v3  ;;  %v1710_v0 = vpop.xlane.xlu0 %1709  ;;  %v1886_v44 = vadd.f32 1e-12, %v1870_v40 }
 0x466   : > { %v2362_v31 = vpop.eup %2361  ;;  %v1974_v20 = vsel %vm1583_vm9, %v1958_v10, 0.0  ;;  %v1959_v4 = vsub.f32 0.0, %v1931_v51  ;;  %v1868_v21 = vadd.f32 %v1852_v37, %v1710_v0  ;;  %v1887_v28 = vadd.f32 1e-12, %v1871_v56  ;;  %v4111_v10 = vld [vmem:[#allocation16_spill] sm:$0xff] }
 0x467   : > { %1991 = vst.msk [vmem:[%s2557_s21 + $0x10] sm:$0xff] %vm4105_vm13, %v1974_v20  ;;  %2371 = vlog2.f32 %v1905_v58  ;;  %v1907_v5 = vmul.f32 %v2362_v31, %v1819_v38  ;;  %v1713_v45 = vpop.xlane.xlu1 %1712  ;;  %vm1587_vm4 = vcmp.ne.s32.totalorder %v4111_v10, 4294967295  ;;  %v1806_v38 = vld [vmem:[#allocation3 + $0x50] sm:$0xff]  ;;  %v1807_v20 = vld [vmem:[#allocation3 + $0x58] sm:$0xff] }
 0x468   : > { %v1975_v22 = vsel %vm1584_vm11, %v1959_v4, 0.0  ;;  %v1884_v62 = vadd.f32 1e-12, %v1868_v21  ;;  %v1869_v47 = vadd.f32 %v1853_v9, %v1713_v45 }
 0x469   : > { %v2364_v60 = vpop.eup %2363  ;;  %1992 = vst.msk [vmem:[%s2557_s21 + $0x18] sm:$0xff] %vm4106_vm12, %v1975_v22  ;;  %2373 = vlog2.f32 %v1907_v5  ;;  %v1728_v57 = vpop.xlane.xlu0 %1727  ;;  %vm4122_vm12 = vmmov %vm4109_vm0 }
 0x46a   : > { %v1925_v25 = vmul.f32 0.6931472, %v2364_v60  ;;  %v1885_v59 = vadd.f32 1e-12, %v1869_v47  ;;  %2375 = vrcp.f32 %v1884_v62  ;;  %v1874_v41 = vadd.f32 %v1858_v63, %v1728_v57 }
 0x46b   : > { %v2366_v55 = vpop.eup %2365  ;;  %v1731_v1 = vpop.xlane.xlu1 %1730 }
 0x46c   : > { %v2368_v36 = vpop.eup %2367  ;;  %v1956_v42 = vsub.f32 0.0, %v1925_v25  ;;  %v1927_v19 = vmul.f32 0.6931472, %v2366_v55  ;;  %2377 = vrcp.f32 %v1885_v59  ;;  %v1875_v27 = vadd.f32 %v1859_v18, %v1731_v1  ;;  %v4115_v59 = vld [vmem:[#allocation14_spill] sm:$0xff] }
 0x46d   : > { %v1901_v24 = vmul.f32 %v2368_v36, %v1816_v43  ;;  %2379 = vrcp.f32 %v1886_v44  ;;  %v1722_v6 = vpop.xlane.xlu0 %1721  ;;  %v1890_v9 = vadd.f32 1e-12, %v1874_v41  ;;  %v1809_v44 = vld [vmem:[#allocation3 + $0x68] sm:$0xff]  ;;  %vm1585_vm7 = vcmp.ne.s32.totalorder %v4115_v59, 4294967295  ;;  %v1810_v18 = vld [vmem:[#allocation3 + $0x70] sm:$0xff] }
 0x46e   : > { %v2370_v7 = vpop.eup %2369  ;;  %v1972_v52 = vsel %vm1581_vm14, %v1956_v42, 0.0  ;;  %v1957_v2 = vsub.f32 0.0, %v1927_v19  ;;  %2381 = vrcp.f32 %v1887_v28  ;;  %v1872_v29 = vadd.f32 %v1856_v23, %v1722_v6  ;;  %v4116_v42 = vld [vmem:[#allocation13_spill] sm:$0xff]  ;;  %v1811_v19 = vld [vmem:[#allocation3 + $0x78] sm:$0xff] }
 0x46f   : > { %1989 = vst.msk [vmem:[%s2557_s21] sm:$0xff] %vm4109_vm0, %v1972_v52  ;;  %2383 = vlog2.f32 %v1901_v24  ;;  %v1903_v53 = vmul.f32 %v2370_v7, %v1817_v14  ;;  %v1725_v37 = vpop.xlane.xlu1 %1724  ;;  %v1891_v51 = vadd.f32 1e-12, %v1875_v27  ;;  %vm1586_vm8 = vcmp.ne.s32.totalorder %v4116_v42, 4294967295 }
 0x470   : > { %v1973_v17 = vsel %vm1582_vm15, %v1957_v2, 0.0  ;;  %v1888_v33 = vadd.f32 1e-12, %v1872_v29  ;;  %v1873_v30 = vadd.f32 %v1857_v34, %v1725_v37  ;;  %vm4124_vm15 = vmmov %vm4109_vm0 }
 0x471   : > { %v2372_v61 = vpop.eup %2371  ;;  %1990 = vst.msk [vmem:[%s2557_s21 + $0x8] sm:$0xff] %vm4110_vm1, %v1973_v17  ;;  %2385 = vlog2.f32 %v1903_v53  ;;  %v1640_v39 = vpop.xlane.xlu0 %1639  ;;  %vm4125_vm1 = vmmov %vm4109_vm0 }
 0x472   : > { %v1937_v3 = vmul.f32 0.6931472, %v2372_v61  ;;  %v1889_v15 = vadd.f32 1e-12, %v1873_v30  ;;  %v1820_v49 = vadd.f32 %v1804_v12, %v1640_v39  ;;  %2387 = vrcp.f32 %v1888_v33  ;;  %v4119_v39 = vld [vmem:[#allocation19_spill] sm:$0xff] }
 0x473   : > { %v2374_v11 = vpop.eup %2373  ;;  %v1643_v50 = vpop.xlane.xlu1 %1642  ;;  %vm1589_vm9 = vcmp.ne.s32.totalorder %v4119_v39, 4294967295 }
 0x474   : > { %v1962_v58 = vsub.f32 0.0, %v1937_v3  ;;  %v1939_v40 = vmul.f32 0.6931472, %v2374_v11  ;;  %2389 = vrcp.f32 %v1889_v15  ;;  %v1821_v0 = vadd.f32 %v1805_v16, %v1643_v50  ;;  %v2376_v31 = vpop.eup %2375  ;;  %v4120_v15 = vld [vmem:[#allocation18_spill] sm:$0xff] }
 0x475   : > { %2391 = vrcp.f32 %v1890_v9  ;;  %v1646_v26 = vpop.xlane.xlu0 %1645  ;;  %v1909_v46 = vmul.f32 %v2376_v31, %v1820_v49  ;;  %vm1590_vm11 = vcmp.ne.s32.totalorder %v4120_v15, 4294967295 }
 0x476   : > { %v2378_v4 = vpop.eup %2377  ;;  %v1978_v56 = vsel %vm1587_vm4, %v1962_v58, 0.0  ;;  %v1963_v21 = vsub.f32 0.0, %v1939_v40  ;;  %v1822_v5 = vadd.f32 %v1806_v38, %v1646_v26  ;;  %2393 = vrcp.f32 %v1891_v51  ;;  %v4121_v51 = vld [vmem:[#allocation21_spill] sm:$0xff] }
 0x477   : > { %v2380_v45 = vpop.eup %2379  ;;  %1995 = vst.msk [vmem:[%s2557_s21 + $0x30] sm:$0xff] %vm4113_vm5, %v1978_v56  ;;  %v1911_v8 = vmul.f32 %v2378_v4, %v1821_v0  ;;  %v1649_v22 = vpop.xlane.xlu1 %1648  ;;  %2395 = vlog2.f32 %v1909_v46  ;;  %vm1591_vm13 = vcmp.ne.s32.totalorder %v4121_v51, 4294967295  ;;  %v4123_v0 = vld [vmem:[#allocation20_spill] sm:$0xff] }
 0x478   : > { %v2382_v62 = vpop.eup %2381  ;;  %v1979_v47 = vsel %vm1588_vm3, %v1963_v21, 0.0  ;;  %v1913_v60 = vmul.f32 %v2380_v45, %v1822_v5  ;;  %v1823_v23 = vadd.f32 %v1807_v20, %v1649_v22  ;;  %vm1592_vm14 = vcmp.ne.s32.totalorder %v4123_v0, 4294967295  ;;  %v4126_v46 = vld [vmem:[#allocation24_spill] sm:$0xff] }
 0x479   : > { %v2384_v34 = vpop.eup %2383  ;;  %1996 = vst.msk [vmem:[%s2557_s21 + $0x38] sm:$0xff] %vm4114_vm6, %v1979_v47  ;;  %2397 = vlog2.f32 %v1911_v8  ;;  %v1652_v32 = vpop.xlane.xlu0 %1651  ;;  %vm1593_vm4 = vcmp.ne.s32.totalorder %v4126_v46, 4294967295  ;;  %v4127_v8 = vld [vmem:[#allocation23_spill] sm:$0xff]  ;;  %v4128_v47 = vld [vmem:[#allocation26_spill] sm:$0xff]  ;;  %vm4129_vm6 = vmmov %vm4109_vm0 }
 0x47a   : > { %v1933_v57 = vmul.f32 0.6931472, %v2384_v34  ;;  %2399 = vlog2.f32 %v1913_v60  ;;  %v1915_v63 = vmul.f32 %v2382_v62, %v1823_v23  ;;  %v1824_v25 = vadd.f32 %v1808_v48, %v1652_v32 }
 0x47b   : > { %v2386_v28 = vpop.eup %2385  ;;  %v1655_v55 = vpop.xlane.xlu1 %1654  ;;  %vm1594_vm3 = vcmp.ne.s32.totalorder %v4127_v8, 4294967295  ;;  %vm1595_vm5 = vcmp.ne.s32.totalorder %v4128_v47, 4294967295 }
 0x47c   : > { %v1960_v35 = vsub.f32 0.0, %v1933_v57  ;;  %v1935_v43 = vmul.f32 0.6931472, %v2386_v28  ;;  %2401 = vlog2.f32 %v1915_v63  ;;  %v1825_v1 = vadd.f32 %v1809_v44, %v1655_v55  ;;  %v2388_v36 = vpop.eup %2387  ;;  %v4130_v44 = vld [vmem:[#allocation25_spill] sm:$0xff] }
 0x47d   : > { %v1658_v54 = vpop.xlane.xlu0 %1657  ;;  %v1917_v6 = vmul.f32 %v2388_v36, %v1824_v25 }
 0x47e   : > { %v2390_v14 = vpop.eup %2389  ;;  %v1976_v24 = vsel %vm1585_vm7, %v1960_v35, 0.0  ;;  %v1961_v41 = vsub.f32 0.0, %v1935_v43  ;;  %v1826_v7 = vadd.f32 %v1810_v18, %v1658_v54  ;;  %vm1596_vm7 = vcmp.ne.s32.totalorder %v4130_v44, 4294967295 }
 0x47f   : > { %v2392_v52 = vpop.eup %2391  ;;  %1993 = vst.msk [vmem:[%s2557_s21 + $0x20] sm:$0xff] %vm4117_vm2, %v1976_v24  ;;  %v1919_v2 = vmul.f32 %v2390_v14, %v1825_v1  ;;  %v1661_v29 = vpop.xlane.xlu1 %1660  ;;  %2403 = vlog2.f32 %v1917_v6  ;;  %vm4132_vm2 = vmmov %vm4109_vm0 }
 0x480   : > { %v1977_v53 = vsel %vm1586_vm8, %v1961_v41, 0.0  ;;  %v1921_v27 = vmul.f32 %v2392_v52, %v1826_v7  ;;  %v1827_v37 = vadd.f32 %v1811_v19, %v1661_v29  ;;  %v2394_v12 = vpop.eup %2393  ;;  %vm4131_vm8 = vmmov %vm4109_vm0 }
 0x481   : > { %1994 = vst.msk [vmem:[%s2557_s21 + $0x28] sm:$0xff] %vm4118_vm10, %v1977_v53  ;;  %2405 = vlog2.f32 %v1919_v2  ;;  %v2396_v17 = vpop.eup %2395  ;;  %vm4133_vm10 = vmmov %vm4109_vm0 }
 0x482   : > { %2407 = vlog2.f32 %v1921_v27  ;;  %v1923_v33 = vmul.f32 %v2394_v12, %v1827_v37  ;;  %v1941_v61 = vmul.f32 0.6931472, %v2396_v17 }
 0x483   : > { %v2398_v30 = vpop.eup %2397 }
 0x484   : > { %v2400_v9 = vpop.eup %2399  ;;  %v1943_v16 = vmul.f32 0.6931472, %v2398_v30  ;;  %2409 = vlog2.f32 %v1923_v33  ;;  %v1964_v3 = vsub.f32 0.0, %v1941_v61 }
 0x485   : > { %v1945_v49 = vmul.f32 0.6931472, %v2400_v9 }
 0x486   : > { %v2402_v11 = vpop.eup %2401  ;;  %v1965_v10 = vsub.f32 0.0, %v1943_v16  ;;  %v1980_v50 = vsel %vm1589_vm9, %v1964_v3, 0.0 }
 0x487   : > { %v1966_v38 = vsub.f32 0.0, %v1945_v49  ;;  %v1947_v58 = vmul.f32 0.6931472, %v2402_v11  ;;  %1997 = vst.msk [vmem:[%s2557_s21 + $0x40] sm:$0xff] %vm4122_vm12, %v1980_v50 }
 0x488   : > { %v1981_v40 = vsel %vm1590_vm11, %v1965_v10, 0.0 }
 0x489   : > { %1998 = vst.msk [vmem:[%s2557_s21 + $0x48] sm:$0xff] %vm4124_vm15, %v1981_v40  ;;  %v1982_v31 = vsel %vm1591_vm13, %v1966_v38, 0.0  ;;  %v1967_v13 = vsub.f32 0.0, %v1947_v58  ;;  %v2404_v26 = vpop.eup %2403 }
 0x48a   : > { %1999 = vst.msk [vmem:[%s2557_s21 + $0x50] sm:$0xff] %vm4109_vm0, %v1982_v31  ;;  %v1949_v56 = vmul.f32 0.6931472, %v2404_v26 }
 0x48b   : > { %v2406_v20 = vpop.eup %2405  ;;  %v1983_v4 = vsel %vm1592_vm14, %v1967_v13, 0.0 }
 0x48c   : > { %v2408_v21 = vpop.eup %2407  ;;  %2000 = vst.msk [vmem:[%s2557_s21 + $0x58] sm:$0xff] %vm4125_vm1, %v1983_v4  ;;  %v1951_v5 = vmul.f32 0.6931472, %v2406_v20  ;;  %v1968_v45 = vsub.f32 0.0, %v1949_v56 }
 0x48d   : > { %v1953_v22 = vmul.f32 0.6931472, %v2408_v21 }
 0x48e   : > { %v2410_v48 = vpop.eup %2409  ;;  %v1969_v62 = vsub.f32 0.0, %v1951_v5  ;;  %v1984_v60 = vsel %vm1593_vm4, %v1968_v45, 0.0 }
 0x48f   : > { %v1970_v23 = vsub.f32 0.0, %v1953_v22  ;;  %v1955_v34 = vmul.f32 0.6931472, %v2410_v48  ;;  %2001 = vst.msk [vmem:[%s2557_s21 + $0x60] sm:$0xff] %vm4129_vm6, %v1984_v60 }
 0x490   : > { %v1985_v32 = vsel %vm1594_vm3, %v1969_v62, 0.0 }
 0x491   : > { %2002 = vst.msk [vmem:[%s2557_s21 + $0x68] sm:$0xff] %vm4131_vm8, %v1985_v32  ;;  %v1986_v57 = vsel %vm1595_vm5, %v1970_v23, 0.0  ;;  %v1971_v63 = vsub.f32 0.0, %v1955_v34 }
 0x492   : > { %2003 = vst.msk [vmem:[%s2557_s21 + $0x70] sm:$0xff] %vm4132_vm2, %v1986_v57 }
 0x493   : > { %v1987_v25 = vsel %vm1596_vm7, %v1971_v63, 0.0 }
 0x494   : > { %2004 = vst.msk [vmem:[%s2557_s21 + $0x78] sm:$0xff] %vm4133_vm10, %v1987_v25 }
 0x495 PF: > { %s17_s26 = sadd.s32 1, %s2433_s26   ;;  %s4134_s24 = smov %s2429_s25 }
 0x496   : > { %p14_p8 = scmp.ge.s32.totalorder %s17_s26, 4   ;;  %s4135_s25 = smov %s4137_s27 }
 0x498   :  { %16 = sbr.rel (!%p14_p8) target bundleno = 2 (0x2), region = 106 }

</bundles_post_ra>
